<compile_context>
chip_gen: v7x
topology: tpu7x:2x2x1
jax: 0.10.0
libtpu: 0.0.40
codegen_flags: <defaults>
</compile_context>

<pallas_src>
import functools

import jax
import jax.numpy as jnp
from jax.experimental import pallas as pl
from jax.experimental.pallas import tpu as pltpu


def _round_up(x, m):
    return ((x + m - 1) // m) * m


# ----------------------------------------------------------------------------
# Static layer-dimension / packed-parameter layout helpers
# ----------------------------------------------------------------------------
def _layer_dims(cfg):
    H = cfg["rnn_hidden_output_dim"]
    if cfg["pre_rnn_layers_num"] == 1:
        pre = [(cfg["input_features_num"], cfg["rnn_input_dim"])]
    else:
        pre = [(cfg["input_features_num"], cfg["pre_rnn_dim"])]
        pre += [(cfg["pre_rnn_dim"], cfg["pre_rnn_dim"])] * (cfg["pre_rnn_layers_num"] - 2)
        pre.append((cfg["pre_rnn_dim"], cfg["rnn_input_dim"]))
    lstm_in = [cfg["rnn_input_dim"]] + [H] * (cfg["rnn_layers_num"] - 1)
    if cfg["post_rnn_layers_num"] == 1:
        post = [(H, cfg["pre_output_dim"])]
    else:
        post = [(H, cfg["post_rnn_dim"])]
        post += [(cfg["post_rnn_dim"], cfg["post_rnn_dim"])] * (cfg["post_rnn_layers_num"] - 2)
        post.append((cfg["post_rnn_dim"], cfg["pre_output_dim"]))
    post.append((cfg["pre_output_dim"], 1))
    return pre, lstm_in, post


def _param_layout(cfg):
    """Static row offsets of every parameter inside the two packed buffers."""
    H = cfg["rnn_hidden_output_dim"]
    pre_dims, lstm_in, post_dims = _layer_dims(cfg)
    wcol = max(128, 4 * H, max(fo for _, fo in pre_dims + post_dims))
    w_off, v_off = 0, 0
    pre, lstm, post = [], [], []
    for fi, fo in pre_dims:
        pre.append(dict(w=w_off, fi=fi, fo=fo, b=v_off))
        w_off += _round_up(fi, 16)          # bf16 sublane-tile alignment
        v_off += 1
    for fi in lstm_in:
        lstm.append(dict(wih=w_off, whh=w_off + _round_up(fi, 16), fi=fi,
                         bias=v_off, h0=v_off + 1, c0=v_off + 2))
        w_off += _round_up(fi, 16) + _round_up(H, 16)
        v_off += 3
    for fi, fo in post_dims:
        post.append(dict(w=w_off, fi=fi, fo=fo, b=v_off))
        w_off += _round_up(fi, 16)
        v_off += 1
    return dict(pre=pre, lstm=lstm, post=post, wcol=wcol,
                w_rows=_round_up(w_off, 16), v_rows=_round_up(v_off, 8))


# ----------------------------------------------------------------------------
# Fused Pallas kernel
# ----------------------------------------------------------------------------
def _fused_rnn_net_kernel(lens_ref, x_ref, w_ref, v_ref, out_ref, hs_ref,
                          *, layout, T, BT, H):
    """Entire RNNNet forward for one batch tile on VMEM-resident data.

    lens_ref : (BT, 1)        int32   valid sequence lengths
    x_ref    : (T*BT, F)      f32     time-major flattened input tile
    w_ref    : (Rw, wcol)     bf16    packed matmul weights (static row views)
    v_ref    : (Rv, wcol)     f32     packed biases / h0 / c0 row vectors
    out_ref  : (T*BT, 1)      f32
    hs_ref   : (T*BT, H)      f32     scratch: per-layer hidden outputs
    """
    bf16, f32 = jnp.bfloat16, jnp.float32

    def linear(x, meta, relu):
        w = w_ref[meta["w"]:meta["w"] + meta["fi"], 0:meta["fo"]]   # bf16
        b = v_ref[meta["b"]:meta["b"] + 1, 0:meta["fo"]]            # (1, fo) f32
        y = jnp.dot(x.astype(bf16), w, preferred_element_type=f32) + b
        return jnp.maximum(y, 0.0) if relu else y

    # ---- pre-RNN MLP (Linear + ReLU), all T*BT rows per matmul
    h = x_ref[...]
    for meta in layout["pre"]:
        h = linear(h, meta, relu=True)

    # Hoisted out of both loops: lane mask selecting the tanh (g) gate block,
    # and the per-row valid-length column for the pack/pad mask.
    lane = jax.lax.broadcasted_iota(jnp.int32, (BT, 4 * H), 1)
    g_lane = (lane >= 2 * H) & (lane < 3 * H)
    lens_col = lens_ref[...]                                   # (BT, 1) int32

    # ---- stacked LSTM with learned initial (h0, c0)
    n_lstm = len(layout["lstm"])
    for li, meta in enumerate(layout["lstm"]):
        wih = w_ref[meta["wih"]:meta["wih"] + meta["fi"], 0:4 * H]   # bf16
        whh = w_ref[meta["whh"]:meta["whh"] + H, 0:4 * H]            # bf16, reused T times
        bias = v_ref[meta["bias"]:meta["bias"] + 1, 0:4 * H]         # (1, 4H) f32
        xin = h if li == 0 else hs_ref[...]
        # input-to-hidden projection for every timestep at once (one matmul)
        xw = jnp.dot(xin.astype(bf16), wih, preferred_element_type=f32) + bias
        h_t = jnp.broadcast_to(v_ref[meta["h0"]:meta["h0"] + 1, 0:H], (BT, H))
        c_t = jnp.broadcast_to(v_ref[meta["c0"]:meta["c0"] + 1, 0:H], (BT, H))
        last = li == n_lstm - 1
        for t in range(T):                         # fully unrolled (T static)
            gates = xw[t * BT:(t + 1) * BT, :] + jnp.dot(
                h_t.astype(bf16), whh, preferred_element_type=f32)   # (BT, 4H)
            # PyTorch gate lane order: [i, f, g, o]. Two full-vreg EUP calls,
            # lane-select, then one XLU roll pairs sigma(i) with tanh(g).
            sig_all = 0.5 * jnp.tanh(0.5 * gates) + 0.5
            tanh_all = jnp.tanh(gates)
            act = jnp.where(g_lane, tanh_all, sig_all)   # [si, sf, tg, so]
            prod = act * pltpu.roll(act, shift=2 * H, axis=1)  # lanes[0:H]=si*tg
            c_t = act[:, H:2 * H] * c_t + prod[:, 0:H]
            h_t = act[:, 3 * H:4 * H] * jnp.tanh(c_t)
            if last:
                # pack_padded / pad_packed + F.relu: padded steps become zero.
                mask_t = (lens_col > t).astype(f32)
                hs_ref[t * BT:(t + 1) * BT, :] = jnp.maximum(h_t, 0.0) * mask_t
            else:
                hs_ref[t * BT:(t + 1) * BT, :] = h_t

    # ---- post-RNN MLP (ReLU on all but the final Linear -> 1)
    y = hs_ref[...]
    n_post = len(layout["post"])
    for idx, meta in enumerate(layout["post"]):
        y = linear(y, meta, relu=(idx < n_post - 1))
    # Note: (T*BT, 1) output is lane-sparse (single masked vst); fine at this
    # width, revisit if the output feature dim ever grows.
    out_ref[...] = y.astype(out_ref.dtype)


# ----------------------------------------------------------------------------
# Deterministic parameter construction (mirrors __init__ shapes)
# ----------------------------------------------------------------------------
def _linear_init(key, fan_in, fan_out):
    kw, kb = jax.random.split(key)
    bound = 1.0 / float(fan_in) ** 0.5
    w = jax.random.uniform(kw, (fan_in, fan_out), jnp.float32, -bound, bound)
    b = jax.random.uniform(kb, (fan_out,), jnp.float32, -bound, bound)
    return w, b


def _lstm_layer_init(key, in_dim, hidden, init_forget_bias):
    k1, k2, k3, k4 = jax.random.split(key, 4)
    bound = 1.0 / float(hidden) ** 0.5
    wih = jax.random.uniform(k1, (in_dim, 4 * hidden), jnp.float32, -bound, bound)
    whh = jax.random.uniform(k2, (hidden, 4 * hidden), jnp.float32, -bound, bound)
    bih = jax.random.uniform(k3, (4 * hidden,), jnp.float32, -bound, bound)
    bhh = jax.random.uniform(k4, (4 * hidden,), jnp.float32, -bound, bound)
    if init_forget_bias:
        # initialize_memory_gate_bias (LSTM): bias[n//4 : n//2] = 1.0 (forget)
        bih = bih.at[hidden:2 * hidden].set(1.0)
        bhh = bhh.at[hidden:2 * hidden].set(1.0)
    return wih, whh, bih + bhh        # fold the two bias vectors once at init


def init_params(key, cfg):
    H = cfg["rnn_hidden_output_dim"]
    pre_dims, lstm_in, post_dims = _layer_dims(cfg)
    keys = jax.random.split(key, 64)
    ki = iter(keys)
    pre = [_linear_init(next(ki), a, b) for a, b in pre_dims]
    lstm = [_lstm_layer_init(next(ki), fi, H, cfg["initialize_memory_gate_bias"])
            for fi in lstm_in]
    h0 = jax.random.normal(next(ki), (cfg["rnn_layers_num"], H), jnp.float32)
    c0 = jax.random.normal(next(ki), (cfg["rnn_layers_num"], H), jnp.float32)
    post = [_linear_init(next(ki), a, b) for a, b in post_dims]
    return {"pre": pre, "lstm": lstm, "h0": h0, "c0": c0, "post": post}


def pack_params(params, cfg):
    """Pack ALL parameters into two buffers (done ONCE): bf16 matmul weights
    and f32 bias/h0/c0 row vectors -> 2 prologue DMAs instead of ~22."""
    layout = _param_layout(cfg)
    H = cfg["rnn_hidden_output_dim"]
    W = jnp.zeros((layout["w_rows"], layout["wcol"]), jnp.float32)
    V = jnp.zeros((layout["v_rows"], layout["wcol"]), jnp.float32)
    for (w, b), meta in zip(params["pre"], layout["pre"]):
        W = W.at[meta["w"]:meta["w"] + meta["fi"], 0:meta["fo"]].set(w)
        V = V.at[meta["b"], 0:meta["fo"]].set(b)
    for l, meta in enumerate(layout["lstm"]):
        wih, whh, bias = params["lstm"][l]
        W = W.at[meta["wih"]:meta["wih"] + meta["fi"], 0:4 * H].set(wih)
        W = W.at[meta["whh"]:meta["whh"] + H, 0:4 * H].set(whh)
        V = V.at[meta["bias"], 0:4 * H].set(bias)
        V = V.at[meta["h0"], 0:H].set(params["h0"][l])
        V = V.at[meta["c0"], 0:H].set(params["c0"][l])
    for (w, b), meta in zip(params["post"], layout["post"]):
        W = W.at[meta["w"]:meta["w"] + meta["fi"], 0:meta["fo"]].set(w)
        V = V.at[meta["b"], 0:meta["fo"]].set(b)
    return W.astype(jnp.bfloat16), V


# ----------------------------------------------------------------------------
# Forward pass (mirrors RNNNet.forward) — single pallas_call, batch-tile grid
# ----------------------------------------------------------------------------
def rnn_net_forward(packed, inputs, lens, cfg, bt=8):
    w_packed, v_packed = packed
    B, T, _ = inputs.shape
    H = cfg["rnn_hidden_output_dim"]
    layout = _param_layout(cfg)

    # Batch tile: 8 sublanes at toy sizes; at production batch use 128 (v5e)
    # or 256 (v6e/v7x) rows per tile to fill the MXU row dimension.
    BT = bt
    BP = _round_up(B, BT)
    NB = BP // BT

    # inputs_sliced = inputs[:, :, 3:]
    x = inputs[:, :, 3:].astype(jnp.float32)
    F_in = x.shape[-1]
    x = jnp.pad(x, ((0, BP - B), (0, 0), (0, 0)))
    lens_p = jnp.pad(lens.astype(jnp.int32), (0, BP - B))

    # Per-tile time-major layout: tile i row (t*BT + bb)  <->  batch i*BT+bb, time t.
    # Sorting by -lens and un-sorting via indices_back cancel; packing only
    # removes padded timesteps, reproduced in-kernel by masking the last LSTM
    # layer's outputs at t >= lens[b].
    # TODO(synk): for production sizes fold this slice/pad/transpose relayout
    # into the BlockSpec index_map so it happens during the tile DMA.
    x_tm = x.reshape(NB, BT, T, F_in).transpose(0, 2, 1, 3).reshape(NB * T * BT, F_in)
    lens_col = lens_p.reshape(NB * BT, 1)

    kernel = functools.partial(_fused_rnn_net_kernel,
                               layout=layout, T=T, BT=BT, H=H)

    out = pl.pallas_call(
        kernel,
        out_shape=jax.ShapeDtypeStruct((NB * T * BT, 1), jnp.float32),
        grid=(NB,),
        in_specs=[
            pl.BlockSpec((BT, 1), lambda i: (i, 0)),                 # lens
            pl.BlockSpec((T * BT, F_in), lambda i: (i, 0)),          # x (time-major tile)
            pl.BlockSpec((layout["w_rows"], layout["wcol"]), lambda i: (0, 0)),  # weights (resident)
            pl.BlockSpec((layout["v_rows"], layout["wcol"]), lambda i: (0, 0)),  # bias/h0/c0 (resident)
        ],
        out_specs=pl.BlockSpec((T * BT, 1), lambda i: (i, 0)),
        scratch_shapes=[pltpu.VMEM((T * BT, H), jnp.float32)],       # per-layer h_t store
        compiler_params=pltpu.CompilerParams(
            dimension_semantics=("parallel",),        # batch tiles -> 2 TCs on v7x
            vmem_limit_bytes=32 * 1024 * 1024),       # explicit budget (v7x-safe)
    )(lens_col, x_tm, w_packed, v_packed)

    # TODO(synk): pad_packed_sequence truncates the time axis to max(lens);
    # static shapes require max(lens) == T here (holds for the example input).
    out = out.reshape(NB, T, BT).transpose(0, 2, 1).reshape(BP, T)
    return out[:B]


# ----------------------------------------------------------------------------
# Pure-JAX reference (matmul operands rounded to bf16 like the kernel)
# ----------------------------------------------------------------------------
def rnn_net_reference(params, inputs, lens, cfg):
    H = cfg["rnn_hidden_output_dim"]
    bf = lambda a: a.astype(jnp.bfloat16).astype(jnp.float32)
    x = inputs[:, :, 3:].astype(jnp.float32)
    B, T, _ = x.shape
    h = x
    for w, b in params["pre"]:
        h = jnp.maximum(jnp.einsum("btf,fo->bto", bf(h), bf(w)) + b, 0.0)
    for l, (wih, whh, bias) in enumerate(params["lstm"]):
        h_t = jnp.broadcast_to(params["h0"][l][None, :], (B, H))
        c_t = jnp.broadcast_to(params["c0"][l][None, :], (B, H))
        outs = []
        for t in range(T):
            gates = bf(h[:, t, :]) @ bf(wih) + bf(h_t) @ bf(whh) + bias
            i_g = jax.nn.sigmoid(gates[:, 0 * H:1 * H])
            f_g = jax.nn.sigmoid(gates[:, 1 * H:2 * H])
            g_g = jnp.tanh(gates[:, 2 * H:3 * H])
            o_g = jax.nn.sigmoid(gates[:, 3 * H:4 * H])
            c_t = f_g * c_t + i_g * g_g
            h_t = o_g * jnp.tanh(c_t)
            outs.append(h_t)
        h = jnp.stack(outs, axis=1)
    mask = (jnp.arange(T)[None, :, None] < lens[:, None, None]).astype(jnp.float32)
    y = jnp.maximum(h, 0.0) * mask
    for idx, (w, b) in enumerate(params["post"]):
        y = jnp.einsum("btf,fo->bto", bf(y), bf(w)) + b
        if idx < len(params["post"]) - 1:
            y = jnp.maximum(y, 0.0)
    return y.reshape(B, T)


# ----------------------------------------------------------------------------
if __name__ == "__main__":
    cfg = dict(
        input_features_num=13,
        rnn_layers_num=2,
        rnn_input_dim=32,
        rnn_hidden_output_dim=32,
        pre_rnn_layers_num=2,
        pre_rnn_dim=32,
        post_rnn_layers_num=2,
        post_rnn_dim=32,
        pre_output_dim=16,
        initialize_memory_gate_bias=True,
    )

    key = jax.random.PRNGKey(0)
    k_par, k_in = jax.random.split(key)
    params = init_params(k_par, cfg)
    packed = pack_params(params, cfg)          # one-time parameter packing

    B, T = 4, 8
    F_total = 3 + cfg["input_features_num"]    # forward drops the first 3 feats
    inputs = jax.random.normal(k_in, (B, T, F_total), jnp.float32)
    lens = jnp.array([8, 5, 8, 3], dtype=jnp.int32)   # max(lens) == T

    # emulate pad_sequence(padding_value=0) from the data loader
    tmask = jnp.arange(T)[None, :, None] < lens[:, None, None]
    inputs = jnp.where(tmask, inputs, 0.0)

    fwd = jax.jit(functools.partial(rnn_net_forward, cfg=cfg))
    out = jax.block_until_ready(fwd(packed, inputs, lens))
    assert out.shape == (B, T) and out.dtype == jnp.float32

    ref = rnn_net_reference(params, inputs, lens, cfg)
    err = float(jnp.max(jnp.abs(out - ref)))
    assert err < 2e-2, f"kernel/reference mismatch, max abs err = {err}"

    print("KERNEL_OK")
</pallas_src>

<mosaic_0001>
module attributes {stable_mosaic.version = 11 : i64} {
  func.func @_fused_rnn_net_kernel(%arg0: i32, %arg1: memref<8x1xi32, #tpu.memory_space<vmem>>, %arg2: memref<64x13xf32, #tpu.memory_space<vmem>>, %arg3: memref<256x128xbf16, #tpu.memory_space<vmem>>, %arg4: memref<16x128xf32, #tpu.memory_space<vmem>>, %arg5: memref<64x1xf32, #tpu.memory_space<vmem>>, %arg6: memref<64x32xf32, #tpu.memory_space<vmem>>) attributes {dimension_semantics = [#tpu.dimension_semantics<parallel>], iteration_bounds = array<i64: 1>, scalar_prefetch = 0 : i64, scratch_operands = 1 : i64, tpu.core_type = #tpu.core_type<tc>, window_params = [{transform_indices = @transform_0, window_bounds = array<i64: 8, 1>}, {transform_indices = @transform_1, window_bounds = array<i64: 64, 13>}, {pipeline_mode = #tpu.pipeline_mode<synchronous>, transform_indices = @transform_2, window_bounds = array<i64: 256, 128>}, {pipeline_mode = #tpu.pipeline_mode<synchronous>, transform_indices = @transform_3, window_bounds = array<i64: 16, 128>}, {transform_indices = @transform_4, window_bounds = array<i64: 64, 1>}]} {
    %c0 = arith.constant 0 : index
    %c0_0 = arith.constant 0 : index
    %0 = vector.load %arg2[%c0, %c0_0] : memref<64x13xf32, #tpu.memory_space<vmem>>, vector<64x13xf32>
    %c0_1 = arith.constant 0 : index
    %c0_2 = arith.constant 0 : index
    %1 = vector.load %arg3[%c0_1, %c0_2] : memref<256x128xbf16, #tpu.memory_space<vmem>>, vector<13x32xbf16>
    %c0_3 = arith.constant 0 : index
    %c0_4 = arith.constant 0 : index
    %2 = vector.load %arg4[%c0_3, %c0_4] : memref<16x128xf32, #tpu.memory_space<vmem>>, vector<1x32xf32>
    %3 = arith.truncf %0 : vector<64x13xf32> to vector<64x13xbf16>
    %cst = arith.constant dense<0.000000e+00> : vector<64x32xf32>
    %4 = tpu.matmul %3, %1, %cst {dimension_numbers = #tpu.dot_dimension_numbers<[1], [0], [0], [1], [0, 0, 1, 1], [], []>} : vector<64x13xbf16>, vector<13x32xbf16>, vector<64x32xf32> -> vector<64x32xf32>
    %5 = vector.broadcast %2 : vector<1x32xf32> to vector<64x32xf32>
    %6 = arith.addf %4, %5 : vector<64x32xf32>
    %cst_5 = arith.constant 0.000000e+00 : f32
    %7 = vector.broadcast %cst_5 : f32 to vector<64x32xf32>
    %8 = arith.maximumf %6, %7 : vector<64x32xf32>
    %c16 = arith.constant 16 : index
    %c0_6 = arith.constant 0 : index
    %9 = vector.load %arg3[%c16, %c0_6] : memref<256x128xbf16, #tpu.memory_space<vmem>>, vector<32x32xbf16>
    %c1 = arith.constant 1 : index
    %c0_7 = arith.constant 0 : index
    %10 = vector.load %arg4[%c1, %c0_7] : memref<16x128xf32, #tpu.memory_space<vmem>>, vector<1x32xf32>
    %11 = arith.truncf %8 : vector<64x32xf32> to vector<64x32xbf16>
    %cst_8 = arith.constant dense<0.000000e+00> : vector<64x32xf32>
    %12 = tpu.matmul %11, %9, %cst_8 {dimension_numbers = #tpu.dot_dimension_numbers<[1], [0], [0], [1], [0, 0, 1, 1], [], []>} : vector<64x32xbf16>, vector<32x32xbf16>, vector<64x32xf32> -> vector<64x32xf32>
    %13 = vector.broadcast %10 : vector<1x32xf32> to vector<64x32xf32>
    %14 = arith.addf %12, %13 : vector<64x32xf32>
    %cst_9 = arith.constant 0.000000e+00 : f32
    %15 = vector.broadcast %cst_9 : f32 to vector<64x32xf32>
    %16 = arith.maximumf %14, %15 : vector<64x32xf32>
    %17 = tpu.iota {dimensions = array<i32: 1>} : vector<8x128xi32>
    %c64_i32 = arith.constant 64 : i32
    %18 = vector.broadcast %c64_i32 : i32 to vector<8x128xi32>
    %19 = arith.cmpi sge, %17, %18 : vector<8x128xi32>
    %c96_i32 = arith.constant 96 : i32
    %20 = vector.broadcast %c96_i32 : i32 to vector<8x128xi32>
    %21 = arith.cmpi slt, %17, %20 : vector<8x128xi32>
    %22 = arith.andi %19, %21 : vector<8x128xi1>
    %c0_10 = arith.constant 0 : index
    %c0_11 = arith.constant 0 : index
    %23 = vector.load %arg1[%c0_10, %c0_11] : memref<8x1xi32, #tpu.memory_space<vmem>>, vector<8x1xi32>
    %c48 = arith.constant 48 : index
    %c0_12 = arith.constant 0 : index
    %24 = vector.load %arg3[%c48, %c0_12] : memref<256x128xbf16, #tpu.memory_space<vmem>>, vector<32x128xbf16>
    %c80 = arith.constant 80 : index
    %c0_13 = arith.constant 0 : index
    %25 = vector.load %arg3[%c80, %c0_13] : memref<256x128xbf16, #tpu.memory_space<vmem>>, vector<32x128xbf16>
    %c2 = arith.constant 2 : index
    %c0_14 = arith.constant 0 : index
    %26 = vector.load %arg4[%c2, %c0_14] : memref<16x128xf32, #tpu.memory_space<vmem>>, vector<1x128xf32>
    %27 = arith.truncf %16 : vector<64x32xf32> to vector<64x32xbf16>
    %cst_15 = arith.constant dense<0.000000e+00> : vector<64x128xf32>
    %28 = tpu.matmul %27, %24, %cst_15 {dimension_numbers = #tpu.dot_dimension_numbers<[1], [0], [0], [1], [0, 0, 1, 1], [], []>} : vector<64x32xbf16>, vector<32x128xbf16>, vector<64x128xf32> -> vector<64x128xf32>
    %29 = vector.broadcast %26 : vector<1x128xf32> to vector<64x128xf32>
    %30 = arith.addf %28, %29 : vector<64x128xf32>
    %c3 = arith.constant 3 : index
    %c0_16 = arith.constant 0 : index
    %31 = vector.load %arg4[%c3, %c0_16] : memref<16x128xf32, #tpu.memory_space<vmem>>, vector<1x32xf32>
    %32 = vector.shape_cast %31 : vector<1x32xf32> to vector<1x32xf32>
    %33 = vector.broadcast %32 : vector<1x32xf32> to vector<8x32xf32>
    %c4 = arith.constant 4 : index
    %c0_17 = arith.constant 0 : index
    %34 = vector.load %arg4[%c4, %c0_17] : memref<16x128xf32, #tpu.memory_space<vmem>>, vector<1x32xf32>
    %35 = vector.shape_cast %34 : vector<1x32xf32> to vector<1x32xf32>
    %36 = vector.broadcast %35 : vector<1x32xf32> to vector<8x32xf32>
    %37 = vector.extract_strided_slice %30 {offsets = [0, 0], sizes = [8, 128], strides = [1, 1]} : vector<64x128xf32> to vector<8x128xf32>
    %38 = arith.truncf %33 : vector<8x32xf32> to vector<8x32xbf16>
    %cst_18 = arith.constant dense<0.000000e+00> : vector<8x128xf32>
    %39 = tpu.matmul %38, %25, %cst_18 {dimension_numbers = #tpu.dot_dimension_numbers<[1], [0], [0], [1], [0, 0, 1, 1], [], []>} : vector<8x32xbf16>, vector<32x128xbf16>, vector<8x128xf32> -> vector<8x128xf32>
    %40 = arith.addf %37, %39 : vector<8x128xf32>
    %cst_19 = arith.constant 5.000000e-01 : f32
    %41 = vector.broadcast %cst_19 : f32 to vector<8x128xf32>
    %42 = arith.mulf %41, %40 : vector<8x128xf32>
    %43 = math.tanh %42 : vector<8x128xf32>
    %cst_20 = arith.constant 5.000000e-01 : f32
    %44 = vector.broadcast %cst_20 : f32 to vector<8x128xf32>
    %45 = arith.mulf %44, %43 : vector<8x128xf32>
    %cst_21 = arith.constant 5.000000e-01 : f32
    %46 = vector.broadcast %cst_21 : f32 to vector<8x128xf32>
    %47 = arith.addf %45, %46 : vector<8x128xf32>
    %48 = math.tanh %40 : vector<8x128xf32>
    %49 = arith.select %22, %48, %47 : vector<8x128xi1>, vector<8x128xf32>
    %c64_i32_22 = arith.constant 64 : i32
    %50 = tpu.dynamic_rotate %49 by %c64_i32_22 dim 1 : vector<8x128xf32>, i32 -> vector<8x128xf32>
    %51 = arith.mulf %49, %50 : vector<8x128xf32>
    %52 = vector.extract_strided_slice %49 {offsets = [0, 32], sizes = [8, 32], strides = [1, 1]} : vector<8x128xf32> to vector<8x32xf32>
    %53 = arith.mulf %52, %36 : vector<8x32xf32>
    %54 = vector.extract_strided_slice %51 {offsets = [0, 0], sizes = [8, 32], strides = [1, 1]} : vector<8x128xf32> to vector<8x32xf32>
    %55 = arith.addf %53, %54 : vector<8x32xf32>
    %56 = vector.extract_strided_slice %49 {offsets = [0, 96], sizes = [8, 32], strides = [1, 1]} : vector<8x128xf32> to vector<8x32xf32>
    %57 = math.tanh %55 : vector<8x32xf32>
    %58 = arith.mulf %56, %57 : vector<8x32xf32>
    %c0_23 = arith.constant 0 : index
    %c0_24 = arith.constant 0 : index
    %59 = vector.load %arg6[%c0_23, %c0_24] : memref<64x32xf32, #tpu.memory_space<vmem>>, vector<8x32xf32>
    tpu.vector_store %arg6[%c0_23, %c0_24], %58 {strides = array<i32>} : memref<64x32xf32, #tpu.memory_space<vmem>>, vector<8x32xf32>,
    %60 = vector.extract_strided_slice %30 {offsets = [8, 0], sizes = [8, 128], strides = [1, 1]} : vector<64x128xf32> to vector<8x128xf32>
    %61 = arith.truncf %58 : vector<8x32xf32> to vector<8x32xbf16>
    %cst_25 = arith.constant dense<0.000000e+00> : vector<8x128xf32>
    %62 = tpu.matmul %61, %25, %cst_25 {dimension_numbers = #tpu.dot_dimension_numbers<[1], [0], [0], [1], [0, 0, 1, 1], [], []>} : vector<8x32xbf16>, vector<32x128xbf16>, vector<8x128xf32> -> vector<8x128xf32>
    %63 = arith.addf %60, %62 : vector<8x128xf32>
    %cst_26 = arith.constant 5.000000e-01 : f32
    %64 = vector.broadcast %cst_26 : f32 to vector<8x128xf32>
    %65 = arith.mulf %64, %63 : vector<8x128xf32>
    %66 = math.tanh %65 : vector<8x128xf32>
    %cst_27 = arith.constant 5.000000e-01 : f32
    %67 = vector.broadcast %cst_27 : f32 to vector<8x128xf32>
    %68 = arith.mulf %67, %66 : vector<8x128xf32>
    %cst_28 = arith.constant 5.000000e-01 : f32
    %69 = vector.broadcast %cst_28 : f32 to vector<8x128xf32>
    %70 = arith.addf %68, %69 : vector<8x128xf32>
    %71 = math.tanh %63 : vector<8x128xf32>
    %72 = arith.select %22, %71, %70 : vector<8x128xi1>, vector<8x128xf32>
    %c64_i32_29 = arith.constant 64 : i32
    %73 = tpu.dynamic_rotate %72 by %c64_i32_29 dim 1 : vector<8x128xf32>, i32 -> vector<8x128xf32>
    %74 = arith.mulf %72, %73 : vector<8x128xf32>
    %75 = vector.extract_strided_slice %72 {offsets = [0, 32], sizes = [8, 32], strides = [1, 1]} : vector<8x128xf32> to vector<8x32xf32>
    %76 = arith.mulf %75, %55 : vector<8x32xf32>
    %77 = vector.extract_strided_slice %74 {offsets = [0, 0], sizes = [8, 32], strides = [1, 1]} : vector<8x128xf32> to vector<8x32xf32>
    %78 = arith.addf %76, %77 : vector<8x32xf32>
    %79 = vector.extract_strided_slice %72 {offsets = [0, 96], sizes = [8, 32], strides = [1, 1]} : vector<8x128xf32> to vector<8x32xf32>
    %80 = math.tanh %78 : vector<8x32xf32>
    %81 = arith.mulf %79, %80 : vector<8x32xf32>
    %c8 = arith.constant 8 : index
    %c0_30 = arith.constant 0 : index
    %82 = vector.load %arg6[%c8, %c0_30] : memref<64x32xf32, #tpu.memory_space<vmem>>, vector<8x32xf32>
    tpu.vector_store %arg6[%c8, %c0_30], %81 {strides = array<i32>} : memref<64x32xf32, #tpu.memory_space<vmem>>, vector<8x32xf32>,
    %83 = vector.extract_strided_slice %30 {offsets = [16, 0], sizes = [8, 128], strides = [1, 1]} : vector<64x128xf32> to vector<8x128xf32>
    %84 = arith.truncf %81 : vector<8x32xf32> to vector<8x32xbf16>
    %cst_31 = arith.constant dense<0.000000e+00> : vector<8x128xf32>
    %85 = tpu.matmul %84, %25, %cst_31 {dimension_numbers = #tpu.dot_dimension_numbers<[1], [0], [0], [1], [0, 0, 1, 1], [], []>} : vector<8x32xbf16>, vector<32x128xbf16>, vector<8x128xf32> -> vector<8x128xf32>
    %86 = arith.addf %83, %85 : vector<8x128xf32>
    %cst_32 = arith.constant 5.000000e-01 : f32
    %87 = vector.broadcast %cst_32 : f32 to vector<8x128xf32>
    %88 = arith.mulf %87, %86 : vector<8x128xf32>
    %89 = math.tanh %88 : vector<8x128xf32>
    %cst_33 = arith.constant 5.000000e-01 : f32
    %90 = vector.broadcast %cst_33 : f32 to vector<8x128xf32>
    %91 = arith.mulf %90, %89 : vector<8x128xf32>
    %cst_34 = arith.constant 5.000000e-01 : f32
    %92 = vector.broadcast %cst_34 : f32 to vector<8x128xf32>
    %93 = arith.addf %91, %92 : vector<8x128xf32>
    %94 = math.tanh %86 : vector<8x128xf32>
    %95 = arith.select %22, %94, %93 : vector<8x128xi1>, vector<8x128xf32>
    %c64_i32_35 = arith.constant 64 : i32
    %96 = tpu.dynamic_rotate %95 by %c64_i32_35 dim 1 : vector<8x128xf32>, i32 -> vector<8x128xf32>
    %97 = arith.mulf %95, %96 : vector<8x128xf32>
    %98 = vector.extract_strided_slice %95 {offsets = [0, 32], sizes = [8, 32], strides = [1, 1]} : vector<8x128xf32> to vector<8x32xf32>
    %99 = arith.mulf %98, %78 : vector<8x32xf32>
    %100 = vector.extract_strided_slice %97 {offsets = [0, 0], sizes = [8, 32], strides = [1, 1]} : vector<8x128xf32> to vector<8x32xf32>
    %101 = arith.addf %99, %100 : vector<8x32xf32>
    %102 = vector.extract_strided_slice %95 {offsets = [0, 96], sizes = [8, 32], strides = [1, 1]} : vector<8x128xf32> to vector<8x32xf32>
    %103 = math.tanh %101 : vector<8x32xf32>
    %104 = arith.mulf %102, %103 : vector<8x32xf32>
    %c16_36 = arith.constant 16 : index
    %c0_37 = arith.constant 0 : index
    %105 = vector.load %arg6[%c16_36, %c0_37] : memref<64x32xf32, #tpu.memory_space<vmem>>, vector<8x32xf32>
    tpu.vector_store %arg6[%c16_36, %c0_37], %104 {strides = array<i32>} : memref<64x32xf32, #tpu.memory_space<vmem>>, vector<8x32xf32>,
    %106 = vector.extract_strided_slice %30 {offsets = [24, 0], sizes = [8, 128], strides = [1, 1]} : vector<64x128xf32> to vector<8x128xf32>
    %107 = arith.truncf %104 : vector<8x32xf32> to vector<8x32xbf16>
    %cst_38 = arith.constant dense<0.000000e+00> : vector<8x128xf32>
    %108 = tpu.matmul %107, %25, %cst_38 {dimension_numbers = #tpu.dot_dimension_numbers<[1], [0], [0], [1], [0, 0, 1, 1], [], []>} : vector<8x32xbf16>, vector<32x128xbf16>, vector<8x128xf32> -> vector<8x128xf32>
    %109 = arith.addf %106, %108 : vector<8x128xf32>
    %cst_39 = arith.constant 5.000000e-01 : f32
    %110 = vector.broadcast %cst_39 : f32 to vector<8x128xf32>
    %111 = arith.mulf %110, %109 : vector<8x128xf32>
    %112 = math.tanh %111 : vector<8x128xf32>
    %cst_40 = arith.constant 5.000000e-01 : f32
    %113 = vector.broadcast %cst_40 : f32 to vector<8x128xf32>
    %114 = arith.mulf %113, %112 : vector<8x128xf32>
    %cst_41 = arith.constant 5.000000e-01 : f32
    %115 = vector.broadcast %cst_41 : f32 to vector<8x128xf32>
    %116 = arith.addf %114, %115 : vector<8x128xf32>
    %117 = math.tanh %109 : vector<8x128xf32>
    %118 = arith.select %22, %117, %116 : vector<8x128xi1>, vector<8x128xf32>
    %c64_i32_42 = arith.constant 64 : i32
    %119 = tpu.dynamic_rotate %118 by %c64_i32_42 dim 1 : vector<8x128xf32>, i32 -> vector<8x128xf32>
    %120 = arith.mulf %118, %119 : vector<8x128xf32>
    %121 = vector.extract_strided_slice %118 {offsets = [0, 32], sizes = [8, 32], strides = [1, 1]} : vector<8x128xf32> to vector<8x32xf32>
    %122 = arith.mulf %121, %101 : vector<8x32xf32>
    %123 = vector.extract_strided_slice %120 {offsets = [0, 0], sizes = [8, 32], strides = [1, 1]} : vector<8x128xf32> to vector<8x32xf32>
    %124 = arith.addf %122, %123 : vector<8x32xf32>
    %125 = vector.extract_strided_slice %118 {offsets = [0, 96], sizes = [8, 32], strides = [1, 1]} : vector<8x128xf32> to vector<8x32xf32>
    %126 = math.tanh %124 : vector<8x32xf32>
    %127 = arith.mulf %125, %126 : vector<8x32xf32>
    %c24 = arith.constant 24 : index
    %c0_43 = arith.constant 0 : index
    %128 = vector.load %arg6[%c24, %c0_43] : memref<64x32xf32, #tpu.memory_space<vmem>>, vector<8x32xf32>
    tpu.vector_store %arg6[%c24, %c0_43], %127 {strides = array<i32>} : memref<64x32xf32, #tpu.memory_space<vmem>>, vector<8x32xf32>,
    %129 = vector.extract_strided_slice %30 {offsets = [32, 0], sizes = [8, 128], strides = [1, 1]} : vector<64x128xf32> to vector<8x128xf32>
    %130 = arith.truncf %127 : vector<8x32xf32> to vector<8x32xbf16>
    %cst_44 = arith.constant dense<0.000000e+00> : vector<8x128xf32>
    %131 = tpu.matmul %130, %25, %cst_44 {dimension_numbers = #tpu.dot_dimension_numbers<[1], [0], [0], [1], [0, 0, 1, 1], [], []>} : vector<8x32xbf16>, vector<32x128xbf16>, vector<8x128xf32> -> vector<8x128xf32>
    %132 = arith.addf %129, %131 : vector<8x128xf32>
    %cst_45 = arith.constant 5.000000e-01 : f32
    %133 = vector.broadcast %cst_45 : f32 to vector<8x128xf32>
    %134 = arith.mulf %133, %132 : vector<8x128xf32>
    %135 = math.tanh %134 : vector<8x128xf32>
    %cst_46 = arith.constant 5.000000e-01 : f32
    %136 = vector.broadcast %cst_46 : f32 to vector<8x128xf32>
    %137 = arith.mulf %136, %135 : vector<8x128xf32>
    %cst_47 = arith.constant 5.000000e-01 : f32
    %138 = vector.broadcast %cst_47 : f32 to vector<8x128xf32>
    %139 = arith.addf %137, %138 : vector<8x128xf32>
    %140 = math.tanh %132 : vector<8x128xf32>
    %141 = arith.select %22, %140, %139 : vector<8x128xi1>, vector<8x128xf32>
    %c64_i32_48 = arith.constant 64 : i32
    %142 = tpu.dynamic_rotate %141 by %c64_i32_48 dim 1 : vector<8x128xf32>, i32 -> vector<8x128xf32>
    %143 = arith.mulf %141, %142 : vector<8x128xf32>
    %144 = vector.extract_strided_slice %141 {offsets = [0, 32], sizes = [8, 32], strides = [1, 1]} : vector<8x128xf32> to vector<8x32xf32>
    %145 = arith.mulf %144, %124 : vector<8x32xf32>
    %146 = vector.extract_strided_slice %143 {offsets = [0, 0], sizes = [8, 32], strides = [1, 1]} : vector<8x128xf32> to vector<8x32xf32>
    %147 = arith.addf %145, %146 : vector<8x32xf32>
    %148 = vector.extract_strided_slice %141 {offsets = [0, 96], sizes = [8, 32], strides = [1, 1]} : vector<8x128xf32> to vector<8x32xf32>
    %149 = math.tanh %147 : vector<8x32xf32>
    %150 = arith.mulf %148, %149 : vector<8x32xf32>
    %c32 = arith.constant 32 : index
    %c0_49 = arith.constant 0 : index
    %151 = vector.load %arg6[%c32, %c0_49] : memref<64x32xf32, #tpu.memory_space<vmem>>, vector<8x32xf32>
    tpu.vector_store %arg6[%c32, %c0_49], %150 {strides = array<i32>} : memref<64x32xf32, #tpu.memory_space<vmem>>, vector<8x32xf32>,
    %152 = vector.extract_strided_slice %30 {offsets = [40, 0], sizes = [8, 128], strides = [1, 1]} : vector<64x128xf32> to vector<8x128xf32>
    %153 = arith.truncf %150 : vector<8x32xf32> to vector<8x32xbf16>
    %cst_50 = arith.constant dense<0.000000e+00> : vector<8x128xf32>
    %154 = tpu.matmul %153, %25, %cst_50 {dimension_numbers = #tpu.dot_dimension_numbers<[1], [0], [0], [1], [0, 0, 1, 1], [], []>} : vector<8x32xbf16>, vector<32x128xbf16>, vector<8x128xf32> -> vector<8x128xf32>
    %155 = arith.addf %152, %154 : vector<8x128xf32>
    %cst_51 = arith.constant 5.000000e-01 : f32
    %156 = vector.broadcast %cst_51 : f32 to vector<8x128xf32>
    %157 = arith.mulf %156, %155 : vector<8x128xf32>
    %158 = math.tanh %157 : vector<8x128xf32>
    %cst_52 = arith.constant 5.000000e-01 : f32
    %159 = vector.broadcast %cst_52 : f32 to vector<8x128xf32>
    %160 = arith.mulf %159, %158 : vector<8x128xf32>
    %cst_53 = arith.constant 5.000000e-01 : f32
    %161 = vector.broadcast %cst_53 : f32 to vector<8x128xf32>
    %162 = arith.addf %160, %161 : vector<8x128xf32>
    %163 = math.tanh %155 : vector<8x128xf32>
    %164 = arith.select %22, %163, %162 : vector<8x128xi1>, vector<8x128xf32>
    %c64_i32_54 = arith.constant 64 : i32
    %165 = tpu.dynamic_rotate %164 by %c64_i32_54 dim 1 : vector<8x128xf32>, i32 -> vector<8x128xf32>
    %166 = arith.mulf %164, %165 : vector<8x128xf32>
    %167 = vector.extract_strided_slice %164 {offsets = [0, 32], sizes = [8, 32], strides = [1, 1]} : vector<8x128xf32> to vector<8x32xf32>
    %168 = arith.mulf %167, %147 : vector<8x32xf32>
    %169 = vector.extract_strided_slice %166 {offsets = [0, 0], sizes = [8, 32], strides = [1, 1]} : vector<8x128xf32> to vector<8x32xf32>
    %170 = arith.addf %168, %169 : vector<8x32xf32>
    %171 = vector.extract_strided_slice %164 {offsets = [0, 96], sizes = [8, 32], strides = [1, 1]} : vector<8x128xf32> to vector<8x32xf32>
    %172 = math.tanh %170 : vector<8x32xf32>
    %173 = arith.mulf %171, %172 : vector<8x32xf32>
    %c40 = arith.constant 40 : index
    %c0_55 = arith.constant 0 : index
    %174 = vector.load %arg6[%c40, %c0_55] : memref<64x32xf32, #tpu.memory_space<vmem>>, vector<8x32xf32>
    tpu.vector_store %arg6[%c40, %c0_55], %173 {strides = array<i32>} : memref<64x32xf32, #tpu.memory_space<vmem>>, vector<8x32xf32>,
    %175 = vector.extract_strided_slice %30 {offsets = [48, 0], sizes = [8, 128], strides = [1, 1]} : vector<64x128xf32> to vector<8x128xf32>
    %176 = arith.truncf %173 : vector<8x32xf32> to vector<8x32xbf16>
    %cst_56 = arith.constant dense<0.000000e+00> : vector<8x128xf32>
    %177 = tpu.matmul %176, %25, %cst_56 {dimension_numbers = #tpu.dot_dimension_numbers<[1], [0], [0], [1], [0, 0, 1, 1], [], []>} : vector<8x32xbf16>, vector<32x128xbf16>, vector<8x128xf32> -> vector<8x128xf32>
    %178 = arith.addf %175, %177 : vector<8x128xf32>
    %cst_57 = arith.constant 5.000000e-01 : f32
    %179 = vector.broadcast %cst_57 : f32 to vector<8x128xf32>
    %180 = arith.mulf %179, %178 : vector<8x128xf32>
    %181 = math.tanh %180 : vector<8x128xf32>
    %cst_58 = arith.constant 5.000000e-01 : f32
    %182 = vector.broadcast %cst_58 : f32 to vector<8x128xf32>
    %183 = arith.mulf %182, %181 : vector<8x128xf32>
    %cst_59 = arith.constant 5.000000e-01 : f32
    %184 = vector.broadcast %cst_59 : f32 to vector<8x128xf32>
    %185 = arith.addf %183, %184 : vector<8x128xf32>
    %186 = math.tanh %178 : vector<8x128xf32>
    %187 = arith.select %22, %186, %185 : vector<8x128xi1>, vector<8x128xf32>
    %c64_i32_60 = arith.constant 64 : i32
    %188 = tpu.dynamic_rotate %187 by %c64_i32_60 dim 1 : vector<8x128xf32>, i32 -> vector<8x128xf32>
    %189 = arith.mulf %187, %188 : vector<8x128xf32>
    %190 = vector.extract_strided_slice %187 {offsets = [0, 32], sizes = [8, 32], strides = [1, 1]} : vector<8x128xf32> to vector<8x32xf32>
    %191 = arith.mulf %190, %170 : vector<8x32xf32>
    %192 = vector.extract_strided_slice %189 {offsets = [0, 0], sizes = [8, 32], strides = [1, 1]} : vector<8x128xf32> to vector<8x32xf32>
    %193 = arith.addf %191, %192 : vector<8x32xf32>
    %194 = vector.extract_strided_slice %187 {offsets = [0, 96], sizes = [8, 32], strides = [1, 1]} : vector<8x128xf32> to vector<8x32xf32>
    %195 = math.tanh %193 : vector<8x32xf32>
    %196 = arith.mulf %194, %195 : vector<8x32xf32>
    %c48_61 = arith.constant 48 : index
    %c0_62 = arith.constant 0 : index
    %197 = vector.load %arg6[%c48_61, %c0_62] : memref<64x32xf32, #tpu.memory_space<vmem>>, vector<8x32xf32>
    tpu.vector_store %arg6[%c48_61, %c0_62], %196 {strides = array<i32>} : memref<64x32xf32, #tpu.memory_space<vmem>>, vector<8x32xf32>,
    %198 = vector.extract_strided_slice %30 {offsets = [56, 0], sizes = [8, 128], strides = [1, 1]} : vector<64x128xf32> to vector<8x128xf32>
    %199 = arith.truncf %196 : vector<8x32xf32> to vector<8x32xbf16>
    %cst_63 = arith.constant dense<0.000000e+00> : vector<8x128xf32>
    %200 = tpu.matmul %199, %25, %cst_63 {dimension_numbers = #tpu.dot_dimension_numbers<[1], [0], [0], [1], [0, 0, 1, 1], [], []>} : vector<8x32xbf16>, vector<32x128xbf16>, vector<8x128xf32> -> vector<8x128xf32>
    %201 = arith.addf %198, %200 : vector<8x128xf32>
    %cst_64 = arith.constant 5.000000e-01 : f32
    %202 = vector.broadcast %cst_64 : f32 to vector<8x128xf32>
    %203 = arith.mulf %202, %201 : vector<8x128xf32>
    %204 = math.tanh %203 : vector<8x128xf32>
    %cst_65 = arith.constant 5.000000e-01 : f32
    %205 = vector.broadcast %cst_65 : f32 to vector<8x128xf32>
    %206 = arith.mulf %205, %204 : vector<8x128xf32>
    %cst_66 = arith.constant 5.000000e-01 : f32
    %207 = vector.broadcast %cst_66 : f32 to vector<8x128xf32>
    %208 = arith.addf %206, %207 : vector<8x128xf32>
    %209 = math.tanh %201 : vector<8x128xf32>
    %210 = arith.select %22, %209, %208 : vector<8x128xi1>, vector<8x128xf32>
    %c64_i32_67 = arith.constant 64 : i32
    %211 = tpu.dynamic_rotate %210 by %c64_i32_67 dim 1 : vector<8x128xf32>, i32 -> vector<8x128xf32>
    %212 = arith.mulf %210, %211 : vector<8x128xf32>
    %213 = vector.extract_strided_slice %210 {offsets = [0, 32], sizes = [8, 32], strides = [1, 1]} : vector<8x128xf32> to vector<8x32xf32>
    %214 = arith.mulf %213, %193 : vector<8x32xf32>
    %215 = vector.extract_strided_slice %212 {offsets = [0, 0], sizes = [8, 32], strides = [1, 1]} : vector<8x128xf32> to vector<8x32xf32>
    %216 = arith.addf %214, %215 : vector<8x32xf32>
    %217 = vector.extract_strided_slice %210 {offsets = [0, 96], sizes = [8, 32], strides = [1, 1]} : vector<8x128xf32> to vector<8x32xf32>
    %218 = math.tanh %216 : vector<8x32xf32>
    %219 = arith.mulf %217, %218 : vector<8x32xf32>
    %c56 = arith.constant 56 : index
    %c0_68 = arith.constant 0 : index
    %220 = vector.load %arg6[%c56, %c0_68] : memref<64x32xf32, #tpu.memory_space<vmem>>, vector<8x32xf32>
    tpu.vector_store %arg6[%c56, %c0_68], %219 {strides = array<i32>} : memref<64x32xf32, #tpu.memory_space<vmem>>, vector<8x32xf32>,
    %c112 = arith.constant 112 : index
    %c0_69 = arith.constant 0 : index
    %221 = vector.load %arg3[%c112, %c0_69] : memref<256x128xbf16, #tpu.memory_space<vmem>>, vector<32x128xbf16>
    %c144 = arith.constant 144 : index
    %c0_70 = arith.constant 0 : index
    %222 = vector.load %arg3[%c144, %c0_70] : memref<256x128xbf16, #tpu.memory_space<vmem>>, vector<32x128xbf16>
    %c5 = arith.constant 5 : index
    %c0_71 = arith.constant 0 : index
    %223 = vector.load %arg4[%c5, %c0_71] : memref<16x128xf32, #tpu.memory_space<vmem>>, vector<1x128xf32>
    %c0_72 = arith.constant 0 : index
    %c0_73 = arith.constant 0 : index
    %224 = vector.load %arg6[%c0_72, %c0_73] : memref<64x32xf32, #tpu.memory_space<vmem>>, vector<64x32xf32>
    %225 = arith.truncf %224 : vector<64x32xf32> to vector<64x32xbf16>
    %cst_74 = arith.constant dense<0.000000e+00> : vector<64x128xf32>
    %226 = tpu.matmul %225, %221, %cst_74 {dimension_numbers = #tpu.dot_dimension_numbers<[1], [0], [0], [1], [0, 0, 1, 1], [], []>} : vector<64x32xbf16>, vector<32x128xbf16>, vector<64x128xf32> -> vector<64x128xf32>
    %227 = vector.broadcast %223 : vector<1x128xf32> to vector<64x128xf32>
    %228 = arith.addf %226, %227 : vector<64x128xf32>
    %c6 = arith.constant 6 : index
    %c0_75 = arith.constant 0 : index
    %229 = vector.load %arg4[%c6, %c0_75] : memref<16x128xf32, #tpu.memory_space<vmem>>, vector<1x32xf32>
    %230 = vector.shape_cast %229 : vector<1x32xf32> to vector<1x32xf32>
    %231 = vector.broadcast %230 : vector<1x32xf32> to vector<8x32xf32>
    %c7 = arith.constant 7 : index
    %c0_76 = arith.constant 0 : index
    %232 = vector.load %arg4[%c7, %c0_76] : memref<16x128xf32, #tpu.memory_space<vmem>>, vector<1x32xf32>
    %233 = vector.shape_cast %232 : vector<1x32xf32> to vector<1x32xf32>
    %234 = vector.broadcast %233 : vector<1x32xf32> to vector<8x32xf32>
    %235 = vector.extract_strided_slice %228 {offsets = [0, 0], sizes = [8, 128], strides = [1, 1]} : vector<64x128xf32> to vector<8x128xf32>
    %236 = arith.truncf %231 : vector<8x32xf32> to vector<8x32xbf16>
    %cst_77 = arith.constant dense<0.000000e+00> : vector<8x128xf32>
    %237 = tpu.matmul %236, %222, %cst_77 {dimension_numbers = #tpu.dot_dimension_numbers<[1], [0], [0], [1], [0, 0, 1, 1], [], []>} : vector<8x32xbf16>, vector<32x128xbf16>, vector<8x128xf32> -> vector<8x128xf32>
    %238 = arith.addf %235, %237 : vector<8x128xf32>
    %cst_78 = arith.constant 5.000000e-01 : f32
    %239 = vector.broadcast %cst_78 : f32 to vector<8x128xf32>
    %240 = arith.mulf %239, %238 : vector<8x128xf32>
    %241 = math.tanh %240 : vector<8x128xf32>
    %cst_79 = arith.constant 5.000000e-01 : f32
    %242 = vector.broadcast %cst_79 : f32 to vector<8x128xf32>
    %243 = arith.mulf %242, %241 : vector<8x128xf32>
    %cst_80 = arith.constant 5.000000e-01 : f32
    %244 = vector.broadcast %cst_80 : f32 to vector<8x128xf32>
    %245 = arith.addf %243, %244 : vector<8x128xf32>
    %246 = math.tanh %238 : vector<8x128xf32>
    %247 = arith.select %22, %246, %245 : vector<8x128xi1>, vector<8x128xf32>
    %c64_i32_81 = arith.constant 64 : i32
    %248 = tpu.dynamic_rotate %247 by %c64_i32_81 dim 1 : vector<8x128xf32>, i32 -> vector<8x128xf32>
    %249 = arith.mulf %247, %248 : vector<8x128xf32>
    %250 = vector.extract_strided_slice %247 {offsets = [0, 32], sizes = [8, 32], strides = [1, 1]} : vector<8x128xf32> to vector<8x32xf32>
    %251 = arith.mulf %250, %234 : vector<8x32xf32>
    %252 = vector.extract_strided_slice %249 {offsets = [0, 0], sizes = [8, 32], strides = [1, 1]} : vector<8x128xf32> to vector<8x32xf32>
    %253 = arith.addf %251, %252 : vector<8x32xf32>
    %254 = vector.extract_strided_slice %247 {offsets = [0, 96], sizes = [8, 32], strides = [1, 1]} : vector<8x128xf32> to vector<8x32xf32>
    %255 = math.tanh %253 : vector<8x32xf32>
    %256 = arith.mulf %254, %255 : vector<8x32xf32>
    %c0_i32 = arith.constant 0 : i32
    %257 = vector.broadcast %c0_i32 : i32 to vector<8x1xi32>
    %258 = arith.cmpi sgt, %23, %257 : vector<8x1xi32>
    %259 = arith.extui %258 : vector<8x1xi1> to vector<8x1xi32>
    %260 = arith.sitofp %259 : vector<8x1xi32> to vector<8x1xf32>
    %cst_82 = arith.constant 0.000000e+00 : f32
    %261 = vector.broadcast %cst_82 : f32 to vector<8x32xf32>
    %262 = arith.maximumf %256, %261 : vector<8x32xf32>
    %263 = vector.broadcast %260 : vector<8x1xf32> to vector<8x32xf32>
    %264 = arith.mulf %262, %263 : vector<8x32xf32>
    %c0_83 = arith.constant 0 : index
    %c0_84 = arith.constant 0 : index
    %265 = vector.load %arg6[%c0_83, %c0_84] : memref<64x32xf32, #tpu.memory_space<vmem>>, vector<8x32xf32>
    tpu.vector_store %arg6[%c0_83, %c0_84], %264 {strides = array<i32>} : memref<64x32xf32, #tpu.memory_space<vmem>>, vector<8x32xf32>,
    %266 = vector.extract_strided_slice %228 {offsets = [8, 0], sizes = [8, 128], strides = [1, 1]} : vector<64x128xf32> to vector<8x128xf32>
    %267 = arith.truncf %256 : vector<8x32xf32> to vector<8x32xbf16>
    %cst_85 = arith.constant dense<0.000000e+00> : vector<8x128xf32>
    %268 = tpu.matmul %267, %222, %cst_85 {dimension_numbers = #tpu.dot_dimension_numbers<[1], [0], [0], [1], [0, 0, 1, 1], [], []>} : vector<8x32xbf16>, vector<32x128xbf16>, vector<8x128xf32> -> vector<8x128xf32>
    %269 = arith.addf %266, %268 : vector<8x128xf32>
    %cst_86 = arith.constant 5.000000e-01 : f32
    %270 = vector.broadcast %cst_86 : f32 to vector<8x128xf32>
    %271 = arith.mulf %270, %269 : vector<8x128xf32>
    %272 = math.tanh %271 : vector<8x128xf32>
    %cst_87 = arith.constant 5.000000e-01 : f32
    %273 = vector.broadcast %cst_87 : f32 to vector<8x128xf32>
    %274 = arith.mulf %273, %272 : vector<8x128xf32>
    %cst_88 = arith.constant 5.000000e-01 : f32
    %275 = vector.broadcast %cst_88 : f32 to vector<8x128xf32>
    %276 = arith.addf %274, %275 : vector<8x128xf32>
    %277 = math.tanh %269 : vector<8x128xf32>
    %278 = arith.select %22, %277, %276 : vector<8x128xi1>, vector<8x128xf32>
    %c64_i32_89 = arith.constant 64 : i32
    %279 = tpu.dynamic_rotate %278 by %c64_i32_89 dim 1 : vector<8x128xf32>, i32 -> vector<8x128xf32>
    %280 = arith.mulf %278, %279 : vector<8x128xf32>
    %281 = vector.extract_strided_slice %278 {offsets = [0, 32], sizes = [8, 32], strides = [1, 1]} : vector<8x128xf32> to vector<8x32xf32>
    %282 = arith.mulf %281, %253 : vector<8x32xf32>
    %283 = vector.extract_strided_slice %280 {offsets = [0, 0], sizes = [8, 32], strides = [1, 1]} : vector<8x128xf32> to vector<8x32xf32>
    %284 = arith.addf %282, %283 : vector<8x32xf32>
    %285 = vector.extract_strided_slice %278 {offsets = [0, 96], sizes = [8, 32], strides = [1, 1]} : vector<8x128xf32> to vector<8x32xf32>
    %286 = math.tanh %284 : vector<8x32xf32>
    %287 = arith.mulf %285, %286 : vector<8x32xf32>
    %c1_i32 = arith.constant 1 : i32
    %288 = vector.broadcast %c1_i32 : i32 to vector<8x1xi32>
    %289 = arith.cmpi sgt, %23, %288 : vector<8x1xi32>
    %290 = arith.extui %289 : vector<8x1xi1> to vector<8x1xi32>
    %291 = arith.sitofp %290 : vector<8x1xi32> to vector<8x1xf32>
    %cst_90 = arith.constant 0.000000e+00 : f32
    %292 = vector.broadcast %cst_90 : f32 to vector<8x32xf32>
    %293 = arith.maximumf %287, %292 : vector<8x32xf32>
    %294 = vector.broadcast %291 : vector<8x1xf32> to vector<8x32xf32>
    %295 = arith.mulf %293, %294 : vector<8x32xf32>
    %c8_91 = arith.constant 8 : index
    %c0_92 = arith.constant 0 : index
    %296 = vector.load %arg6[%c8_91, %c0_92] : memref<64x32xf32, #tpu.memory_space<vmem>>, vector<8x32xf32>
    tpu.vector_store %arg6[%c8_91, %c0_92], %295 {strides = array<i32>} : memref<64x32xf32, #tpu.memory_space<vmem>>, vector<8x32xf32>,
    %297 = vector.extract_strided_slice %228 {offsets = [16, 0], sizes = [8, 128], strides = [1, 1]} : vector<64x128xf32> to vector<8x128xf32>
    %298 = arith.truncf %287 : vector<8x32xf32> to vector<8x32xbf16>
    %cst_93 = arith.constant dense<0.000000e+00> : vector<8x128xf32>
    %299 = tpu.matmul %298, %222, %cst_93 {dimension_numbers = #tpu.dot_dimension_numbers<[1], [0], [0], [1], [0, 0, 1, 1], [], []>} : vector<8x32xbf16>, vector<32x128xbf16>, vector<8x128xf32> -> vector<8x128xf32>
    %300 = arith.addf %297, %299 : vector<8x128xf32>
    %cst_94 = arith.constant 5.000000e-01 : f32
    %301 = vector.broadcast %cst_94 : f32 to vector<8x128xf32>
    %302 = arith.mulf %301, %300 : vector<8x128xf32>
    %303 = math.tanh %302 : vector<8x128xf32>
    %cst_95 = arith.constant 5.000000e-01 : f32
    %304 = vector.broadcast %cst_95 : f32 to vector<8x128xf32>
    %305 = arith.mulf %304, %303 : vector<8x128xf32>
    %cst_96 = arith.constant 5.000000e-01 : f32
    %306 = vector.broadcast %cst_96 : f32 to vector<8x128xf32>
    %307 = arith.addf %305, %306 : vector<8x128xf32>
    %308 = math.tanh %300 : vector<8x128xf32>
    %309 = arith.select %22, %308, %307 : vector<8x128xi1>, vector<8x128xf32>
    %c64_i32_97 = arith.constant 64 : i32
    %310 = tpu.dynamic_rotate %309 by %c64_i32_97 dim 1 : vector<8x128xf32>, i32 -> vector<8x128xf32>
    %311 = arith.mulf %309, %310 : vector<8x128xf32>
    %312 = vector.extract_strided_slice %309 {offsets = [0, 32], sizes = [8, 32], strides = [1, 1]} : vector<8x128xf32> to vector<8x32xf32>
    %313 = arith.mulf %312, %284 : vector<8x32xf32>
    %314 = vector.extract_strided_slice %311 {offsets = [0, 0], sizes = [8, 32], strides = [1, 1]} : vector<8x128xf32> to vector<8x32xf32>
    %315 = arith.addf %313, %314 : vector<8x32xf32>
    %316 = vector.extract_strided_slice %309 {offsets = [0, 96], sizes = [8, 32], strides = [1, 1]} : vector<8x128xf32> to vector<8x32xf32>
    %317 = math.tanh %315 : vector<8x32xf32>
    %318 = arith.mulf %316, %317 : vector<8x32xf32>
    %c2_i32 = arith.constant 2 : i32
    %319 = vector.broadcast %c2_i32 : i32 to vector<8x1xi32>
    %320 = arith.cmpi sgt, %23, %319 : vector<8x1xi32>
    %321 = arith.extui %320 : vector<8x1xi1> to vector<8x1xi32>
    %322 = arith.sitofp %321 : vector<8x1xi32> to vector<8x1xf32>
    %cst_98 = arith.constant 0.000000e+00 : f32
    %323 = vector.broadcast %cst_98 : f32 to vector<8x32xf32>
    %324 = arith.maximumf %318, %323 : vector<8x32xf32>
    %325 = vector.broadcast %322 : vector<8x1xf32> to vector<8x32xf32>
    %326 = arith.mulf %324, %325 : vector<8x32xf32>
    %c16_99 = arith.constant 16 : index
    %c0_100 = arith.constant 0 : index
    %327 = vector.load %arg6[%c16_99, %c0_100] : memref<64x32xf32, #tpu.memory_space<vmem>>, vector<8x32xf32>
    tpu.vector_store %arg6[%c16_99, %c0_100], %326 {strides = array<i32>} : memref<64x32xf32, #tpu.memory_space<vmem>>, vector<8x32xf32>,
    %328 = vector.extract_strided_slice %228 {offsets = [24, 0], sizes = [8, 128], strides = [1, 1]} : vector<64x128xf32> to vector<8x128xf32>
    %329 = arith.truncf %318 : vector<8x32xf32> to vector<8x32xbf16>
    %cst_101 = arith.constant dense<0.000000e+00> : vector<8x128xf32>
    %330 = tpu.matmul %329, %222, %cst_101 {dimension_numbers = #tpu.dot_dimension_numbers<[1], [0], [0], [1], [0, 0, 1, 1], [], []>} : vector<8x32xbf16>, vector<32x128xbf16>, vector<8x128xf32> -> vector<8x128xf32>
    %331 = arith.addf %328, %330 : vector<8x128xf32>
    %cst_102 = arith.constant 5.000000e-01 : f32
    %332 = vector.broadcast %cst_102 : f32 to vector<8x128xf32>
    %333 = arith.mulf %332, %331 : vector<8x128xf32>
    %334 = math.tanh %333 : vector<8x128xf32>
    %cst_103 = arith.constant 5.000000e-01 : f32
    %335 = vector.broadcast %cst_103 : f32 to vector<8x128xf32>
    %336 = arith.mulf %335, %334 : vector<8x128xf32>
    %cst_104 = arith.constant 5.000000e-01 : f32
    %337 = vector.broadcast %cst_104 : f32 to vector<8x128xf32>
    %338 = arith.addf %336, %337 : vector<8x128xf32>
    %339 = math.tanh %331 : vector<8x128xf32>
    %340 = arith.select %22, %339, %338 : vector<8x128xi1>, vector<8x128xf32>
    %c64_i32_105 = arith.constant 64 : i32
    %341 = tpu.dynamic_rotate %340 by %c64_i32_105 dim 1 : vector<8x128xf32>, i32 -> vector<8x128xf32>
    %342 = arith.mulf %340, %341 : vector<8x128xf32>
    %343 = vector.extract_strided_slice %340 {offsets = [0, 32], sizes = [8, 32], strides = [1, 1]} : vector<8x128xf32> to vector<8x32xf32>
    %344 = arith.mulf %343, %315 : vector<8x32xf32>
    %345 = vector.extract_strided_slice %342 {offsets = [0, 0], sizes = [8, 32], strides = [1, 1]} : vector<8x128xf32> to vector<8x32xf32>
    %346 = arith.addf %344, %345 : vector<8x32xf32>
    %347 = vector.extract_strided_slice %340 {offsets = [0, 96], sizes = [8, 32], strides = [1, 1]} : vector<8x128xf32> to vector<8x32xf32>
    %348 = math.tanh %346 : vector<8x32xf32>
    %349 = arith.mulf %347, %348 : vector<8x32xf32>
    %c3_i32 = arith.constant 3 : i32
    %350 = vector.broadcast %c3_i32 : i32 to vector<8x1xi32>
    %351 = arith.cmpi sgt, %23, %350 : vector<8x1xi32>
    %352 = arith.extui %351 : vector<8x1xi1> to vector<8x1xi32>
    %353 = arith.sitofp %352 : vector<8x1xi32> to vector<8x1xf32>
    %cst_106 = arith.constant 0.000000e+00 : f32
    %354 = vector.broadcast %cst_106 : f32 to vector<8x32xf32>
    %355 = arith.maximumf %349, %354 : vector<8x32xf32>
    %356 = vector.broadcast %353 : vector<8x1xf32> to vector<8x32xf32>
    %357 = arith.mulf %355, %356 : vector<8x32xf32>
    %c24_107 = arith.constant 24 : index
    %c0_108 = arith.constant 0 : index
    %358 = vector.load %arg6[%c24_107, %c0_108] : memref<64x32xf32, #tpu.memory_space<vmem>>, vector<8x32xf32>
    tpu.vector_store %arg6[%c24_107, %c0_108], %357 {strides = array<i32>} : memref<64x32xf32, #tpu.memory_space<vmem>>, vector<8x32xf32>,
    %359 = vector.extract_strided_slice %228 {offsets = [32, 0], sizes = [8, 128], strides = [1, 1]} : vector<64x128xf32> to vector<8x128xf32>
    %360 = arith.truncf %349 : vector<8x32xf32> to vector<8x32xbf16>
    %cst_109 = arith.constant dense<0.000000e+00> : vector<8x128xf32>
    %361 = tpu.matmul %360, %222, %cst_109 {dimension_numbers = #tpu.dot_dimension_numbers<[1], [0], [0], [1], [0, 0, 1, 1], [], []>} : vector<8x32xbf16>, vector<32x128xbf16>, vector<8x128xf32> -> vector<8x128xf32>
    %362 = arith.addf %359, %361 : vector<8x128xf32>
    %cst_110 = arith.constant 5.000000e-01 : f32
    %363 = vector.broadcast %cst_110 : f32 to vector<8x128xf32>
    %364 = arith.mulf %363, %362 : vector<8x128xf32>
    %365 = math.tanh %364 : vector<8x128xf32>
    %cst_111 = arith.constant 5.000000e-01 : f32
    %366 = vector.broadcast %cst_111 : f32 to vector<8x128xf32>
    %367 = arith.mulf %366, %365 : vector<8x128xf32>
    %cst_112 = arith.constant 5.000000e-01 : f32
    %368 = vector.broadcast %cst_112 : f32 to vector<8x128xf32>
    %369 = arith.addf %367, %368 : vector<8x128xf32>
    %370 = math.tanh %362 : vector<8x128xf32>
    %371 = arith.select %22, %370, %369 : vector<8x128xi1>, vector<8x128xf32>
    %c64_i32_113 = arith.constant 64 : i32
    %372 = tpu.dynamic_rotate %371 by %c64_i32_113 dim 1 : vector<8x128xf32>, i32 -> vector<8x128xf32>
    %373 = arith.mulf %371, %372 : vector<8x128xf32>
    %374 = vector.extract_strided_slice %371 {offsets = [0, 32], sizes = [8, 32], strides = [1, 1]} : vector<8x128xf32> to vector<8x32xf32>
    %375 = arith.mulf %374, %346 : vector<8x32xf32>
    %376 = vector.extract_strided_slice %373 {offsets = [0, 0], sizes = [8, 32], strides = [1, 1]} : vector<8x128xf32> to vector<8x32xf32>
    %377 = arith.addf %375, %376 : vector<8x32xf32>
    %378 = vector.extract_strided_slice %371 {offsets = [0, 96], sizes = [8, 32], strides = [1, 1]} : vector<8x128xf32> to vector<8x32xf32>
    %379 = math.tanh %377 : vector<8x32xf32>
    %380 = arith.mulf %378, %379 : vector<8x32xf32>
    %c4_i32 = arith.constant 4 : i32
    %381 = vector.broadcast %c4_i32 : i32 to vector<8x1xi32>
    %382 = arith.cmpi sgt, %23, %381 : vector<8x1xi32>
    %383 = arith.extui %382 : vector<8x1xi1> to vector<8x1xi32>
    %384 = arith.sitofp %383 : vector<8x1xi32> to vector<8x1xf32>
    %cst_114 = arith.constant 0.000000e+00 : f32
    %385 = vector.broadcast %cst_114 : f32 to vector<8x32xf32>
    %386 = arith.maximumf %380, %385 : vector<8x32xf32>
    %387 = vector.broadcast %384 : vector<8x1xf32> to vector<8x32xf32>
    %388 = arith.mulf %386, %387 : vector<8x32xf32>
    %c32_115 = arith.constant 32 : index
    %c0_116 = arith.constant 0 : index
    %389 = vector.load %arg6[%c32_115, %c0_116] : memref<64x32xf32, #tpu.memory_space<vmem>>, vector<8x32xf32>
    tpu.vector_store %arg6[%c32_115, %c0_116], %388 {strides = array<i32>} : memref<64x32xf32, #tpu.memory_space<vmem>>, vector<8x32xf32>,
    %390 = vector.extract_strided_slice %228 {offsets = [40, 0], sizes = [8, 128], strides = [1, 1]} : vector<64x128xf32> to vector<8x128xf32>
    %391 = arith.truncf %380 : vector<8x32xf32> to vector<8x32xbf16>
    %cst_117 = arith.constant dense<0.000000e+00> : vector<8x128xf32>
    %392 = tpu.matmul %391, %222, %cst_117 {dimension_numbers = #tpu.dot_dimension_numbers<[1], [0], [0], [1], [0, 0, 1, 1], [], []>} : vector<8x32xbf16>, vector<32x128xbf16>, vector<8x128xf32> -> vector<8x128xf32>
    %393 = arith.addf %390, %392 : vector<8x128xf32>
    %cst_118 = arith.constant 5.000000e-01 : f32
    %394 = vector.broadcast %cst_118 : f32 to vector<8x128xf32>
    %395 = arith.mulf %394, %393 : vector<8x128xf32>
    %396 = math.tanh %395 : vector<8x128xf32>
    %cst_119 = arith.constant 5.000000e-01 : f32
    %397 = vector.broadcast %cst_119 : f32 to vector<8x128xf32>
    %398 = arith.mulf %397, %396 : vector<8x128xf32>
    %cst_120 = arith.constant 5.000000e-01 : f32
    %399 = vector.broadcast %cst_120 : f32 to vector<8x128xf32>
    %400 = arith.addf %398, %399 : vector<8x128xf32>
    %401 = math.tanh %393 : vector<8x128xf32>
    %402 = arith.select %22, %401, %400 : vector<8x128xi1>, vector<8x128xf32>
    %c64_i32_121 = arith.constant 64 : i32
    %403 = tpu.dynamic_rotate %402 by %c64_i32_121 dim 1 : vector<8x128xf32>, i32 -> vector<8x128xf32>
    %404 = arith.mulf %402, %403 : vector<8x128xf32>
    %405 = vector.extract_strided_slice %402 {offsets = [0, 32], sizes = [8, 32], strides = [1, 1]} : vector<8x128xf32> to vector<8x32xf32>
    %406 = arith.mulf %405, %377 : vector<8x32xf32>
    %407 = vector.extract_strided_slice %404 {offsets = [0, 0], sizes = [8, 32], strides = [1, 1]} : vector<8x128xf32> to vector<8x32xf32>
    %408 = arith.addf %406, %407 : vector<8x32xf32>
    %409 = vector.extract_strided_slice %402 {offsets = [0, 96], sizes = [8, 32], strides = [1, 1]} : vector<8x128xf32> to vector<8x32xf32>
    %410 = math.tanh %408 : vector<8x32xf32>
    %411 = arith.mulf %409, %410 : vector<8x32xf32>
    %c5_i32 = arith.constant 5 : i32
    %412 = vector.broadcast %c5_i32 : i32 to vector<8x1xi32>
    %413 = arith.cmpi sgt, %23, %412 : vector<8x1xi32>
    %414 = arith.extui %413 : vector<8x1xi1> to vector<8x1xi32>
    %415 = arith.sitofp %414 : vector<8x1xi32> to vector<8x1xf32>
    %cst_122 = arith.constant 0.000000e+00 : f32
    %416 = vector.broadcast %cst_122 : f32 to vector<8x32xf32>
    %417 = arith.maximumf %411, %416 : vector<8x32xf32>
    %418 = vector.broadcast %415 : vector<8x1xf32> to vector<8x32xf32>
    %419 = arith.mulf %417, %418 : vector<8x32xf32>
    %c40_123 = arith.constant 40 : index
    %c0_124 = arith.constant 0 : index
    %420 = vector.load %arg6[%c40_123, %c0_124] : memref<64x32xf32, #tpu.memory_space<vmem>>, vector<8x32xf32>
    tpu.vector_store %arg6[%c40_123, %c0_124], %419 {strides = array<i32>} : memref<64x32xf32, #tpu.memory_space<vmem>>, vector<8x32xf32>,
    %421 = vector.extract_strided_slice %228 {offsets = [48, 0], sizes = [8, 128], strides = [1, 1]} : vector<64x128xf32> to vector<8x128xf32>
    %422 = arith.truncf %411 : vector<8x32xf32> to vector<8x32xbf16>
    %cst_125 = arith.constant dense<0.000000e+00> : vector<8x128xf32>
    %423 = tpu.matmul %422, %222, %cst_125 {dimension_numbers = #tpu.dot_dimension_numbers<[1], [0], [0], [1], [0, 0, 1, 1], [], []>} : vector<8x32xbf16>, vector<32x128xbf16>, vector<8x128xf32> -> vector<8x128xf32>
    %424 = arith.addf %421, %423 : vector<8x128xf32>
    %cst_126 = arith.constant 5.000000e-01 : f32
    %425 = vector.broadcast %cst_126 : f32 to vector<8x128xf32>
    %426 = arith.mulf %425, %424 : vector<8x128xf32>
    %427 = math.tanh %426 : vector<8x128xf32>
    %cst_127 = arith.constant 5.000000e-01 : f32
    %428 = vector.broadcast %cst_127 : f32 to vector<8x128xf32>
    %429 = arith.mulf %428, %427 : vector<8x128xf32>
    %cst_128 = arith.constant 5.000000e-01 : f32
    %430 = vector.broadcast %cst_128 : f32 to vector<8x128xf32>
    %431 = arith.addf %429, %430 : vector<8x128xf32>
    %432 = math.tanh %424 : vector<8x128xf32>
    %433 = arith.select %22, %432, %431 : vector<8x128xi1>, vector<8x128xf32>
    %c64_i32_129 = arith.constant 64 : i32
    %434 = tpu.dynamic_rotate %433 by %c64_i32_129 dim 1 : vector<8x128xf32>, i32 -> vector<8x128xf32>
    %435 = arith.mulf %433, %434 : vector<8x128xf32>
    %436 = vector.extract_strided_slice %433 {offsets = [0, 32], sizes = [8, 32], strides = [1, 1]} : vector<8x128xf32> to vector<8x32xf32>
    %437 = arith.mulf %436, %408 : vector<8x32xf32>
    %438 = vector.extract_strided_slice %435 {offsets = [0, 0], sizes = [8, 32], strides = [1, 1]} : vector<8x128xf32> to vector<8x32xf32>
    %439 = arith.addf %437, %438 : vector<8x32xf32>
    %440 = vector.extract_strided_slice %433 {offsets = [0, 96], sizes = [8, 32], strides = [1, 1]} : vector<8x128xf32> to vector<8x32xf32>
    %441 = math.tanh %439 : vector<8x32xf32>
    %442 = arith.mulf %440, %441 : vector<8x32xf32>
    %c6_i32 = arith.constant 6 : i32
    %443 = vector.broadcast %c6_i32 : i32 to vector<8x1xi32>
    %444 = arith.cmpi sgt, %23, %443 : vector<8x1xi32>
    %445 = arith.extui %444 : vector<8x1xi1> to vector<8x1xi32>
    %446 = arith.sitofp %445 : vector<8x1xi32> to vector<8x1xf32>
    %cst_130 = arith.constant 0.000000e+00 : f32
    %447 = vector.broadcast %cst_130 : f32 to vector<8x32xf32>
    %448 = arith.maximumf %442, %447 : vector<8x32xf32>
    %449 = vector.broadcast %446 : vector<8x1xf32> to vector<8x32xf32>
    %450 = arith.mulf %448, %449 : vector<8x32xf32>
    %c48_131 = arith.constant 48 : index
    %c0_132 = arith.constant 0 : index
    %451 = vector.load %arg6[%c48_131, %c0_132] : memref<64x32xf32, #tpu.memory_space<vmem>>, vector<8x32xf32>
    tpu.vector_store %arg6[%c48_131, %c0_132], %450 {strides = array<i32>} : memref<64x32xf32, #tpu.memory_space<vmem>>, vector<8x32xf32>,
    %452 = vector.extract_strided_slice %228 {offsets = [56, 0], sizes = [8, 128], strides = [1, 1]} : vector<64x128xf32> to vector<8x128xf32>
    %453 = arith.truncf %442 : vector<8x32xf32> to vector<8x32xbf16>
    %cst_133 = arith.constant dense<0.000000e+00> : vector<8x128xf32>
    %454 = tpu.matmul %453, %222, %cst_133 {dimension_numbers = #tpu.dot_dimension_numbers<[1], [0], [0], [1], [0, 0, 1, 1], [], []>} : vector<8x32xbf16>, vector<32x128xbf16>, vector<8x128xf32> -> vector<8x128xf32>
    %455 = arith.addf %452, %454 : vector<8x128xf32>
    %cst_134 = arith.constant 5.000000e-01 : f32
    %456 = vector.broadcast %cst_134 : f32 to vector<8x128xf32>
    %457 = arith.mulf %456, %455 : vector<8x128xf32>
    %458 = math.tanh %457 : vector<8x128xf32>
    %cst_135 = arith.constant 5.000000e-01 : f32
    %459 = vector.broadcast %cst_135 : f32 to vector<8x128xf32>
    %460 = arith.mulf %459, %458 : vector<8x128xf32>
    %cst_136 = arith.constant 5.000000e-01 : f32
    %461 = vector.broadcast %cst_136 : f32 to vector<8x128xf32>
    %462 = arith.addf %460, %461 : vector<8x128xf32>
    %463 = math.tanh %455 : vector<8x128xf32>
    %464 = arith.select %22, %463, %462 : vector<8x128xi1>, vector<8x128xf32>
    %c64_i32_137 = arith.constant 64 : i32
    %465 = tpu.dynamic_rotate %464 by %c64_i32_137 dim 1 : vector<8x128xf32>, i32 -> vector<8x128xf32>
    %466 = arith.mulf %464, %465 : vector<8x128xf32>
    %467 = vector.extract_strided_slice %464 {offsets = [0, 32], sizes = [8, 32], strides = [1, 1]} : vector<8x128xf32> to vector<8x32xf32>
    %468 = arith.mulf %467, %439 : vector<8x32xf32>
    %469 = vector.extract_strided_slice %466 {offsets = [0, 0], sizes = [8, 32], strides = [1, 1]} : vector<8x128xf32> to vector<8x32xf32>
    %470 = arith.addf %468, %469 : vector<8x32xf32>
    %471 = vector.extract_strided_slice %464 {offsets = [0, 96], sizes = [8, 32], strides = [1, 1]} : vector<8x128xf32> to vector<8x32xf32>
    %472 = math.tanh %470 : vector<8x32xf32>
    %473 = arith.mulf %471, %472 : vector<8x32xf32>
    %c7_i32 = arith.constant 7 : i32
    %474 = vector.broadcast %c7_i32 : i32 to vector<8x1xi32>
    %475 = arith.cmpi sgt, %23, %474 : vector<8x1xi32>
    %476 = arith.extui %475 : vector<8x1xi1> to vector<8x1xi32>
    %477 = arith.sitofp %476 : vector<8x1xi32> to vector<8x1xf32>
    %cst_138 = arith.constant 0.000000e+00 : f32
    %478 = vector.broadcast %cst_138 : f32 to vector<8x32xf32>
    %479 = arith.maximumf %473, %478 : vector<8x32xf32>
    %480 = vector.broadcast %477 : vector<8x1xf32> to vector<8x32xf32>
    %481 = arith.mulf %479, %480 : vector<8x32xf32>
    %c56_139 = arith.constant 56 : index
    %c0_140 = arith.constant 0 : index
    %482 = vector.load %arg6[%c56_139, %c0_140] : memref<64x32xf32, #tpu.memory_space<vmem>>, vector<8x32xf32>
    tpu.vector_store %arg6[%c56_139, %c0_140], %481 {strides = array<i32>} : memref<64x32xf32, #tpu.memory_space<vmem>>, vector<8x32xf32>,
    %c0_141 = arith.constant 0 : index
    %c0_142 = arith.constant 0 : index
    %483 = vector.load %arg6[%c0_141, %c0_142] : memref<64x32xf32, #tpu.memory_space<vmem>>, vector<64x32xf32>
    %c176 = arith.constant 176 : index
    %c0_143 = arith.constant 0 : index
    %484 = vector.load %arg3[%c176, %c0_143] : memref<256x128xbf16, #tpu.memory_space<vmem>>, vector<32x32xbf16>
    %c8_144 = arith.constant 8 : index
    %c0_145 = arith.constant 0 : index
    %485 = vector.load %arg4[%c8_144, %c0_145] : memref<16x128xf32, #tpu.memory_space<vmem>>, vector<1x32xf32>
    %486 = arith.truncf %483 : vector<64x32xf32> to vector<64x32xbf16>
    %cst_146 = arith.constant dense<0.000000e+00> : vector<64x32xf32>
    %487 = tpu.matmul %486, %484, %cst_146 {dimension_numbers = #tpu.dot_dimension_numbers<[1], [0], [0], [1], [0, 0, 1, 1], [], []>} : vector<64x32xbf16>, vector<32x32xbf16>, vector<64x32xf32> -> vector<64x32xf32>
    %488 = vector.broadcast %485 : vector<1x32xf32> to vector<64x32xf32>
    %489 = arith.addf %487, %488 : vector<64x32xf32>
    %cst_147 = arith.constant 0.000000e+00 : f32
    %490 = vector.broadcast %cst_147 : f32 to vector<64x32xf32>
    %491 = arith.maximumf %489, %490 : vector<64x32xf32>
    %c208 = arith.constant 208 : index
    %c0_148 = arith.constant 0 : index
    %492 = vector.load %arg3[%c208, %c0_148] : memref<256x128xbf16, #tpu.memory_space<vmem>>, vector<32x16xbf16>
    %c9 = arith.constant 9 : index
    %c0_149 = arith.constant 0 : index
    %493 = vector.load %arg4[%c9, %c0_149] : memref<16x128xf32, #tpu.memory_space<vmem>>, vector<1x16xf32>
    %494 = arith.truncf %491 : vector<64x32xf32> to vector<64x32xbf16>
    %cst_150 = arith.constant dense<0.000000e+00> : vector<64x16xf32>
    %495 = tpu.matmul %494, %492, %cst_150 {dimension_numbers = #tpu.dot_dimension_numbers<[1], [0], [0], [1], [0, 0, 1, 1], [], []>} : vector<64x32xbf16>, vector<32x16xbf16>, vector<64x16xf32> -> vector<64x16xf32>
    %496 = vector.broadcast %493 : vector<1x16xf32> to vector<64x16xf32>
    %497 = arith.addf %495, %496 : vector<64x16xf32>
    %cst_151 = arith.constant 0.000000e+00 : f32
    %498 = vector.broadcast %cst_151 : f32 to vector<64x16xf32>
    %499 = arith.maximumf %497, %498 : vector<64x16xf32>
    %c240 = arith.constant 240 : index
    %c0_152 = arith.constant 0 : index
    %500 = vector.load %arg3[%c240, %c0_152] : memref<256x128xbf16, #tpu.memory_space<vmem>>, vector<16x1xbf16>
    %c10 = arith.constant 10 : index
    %c0_153 = arith.constant 0 : index
    %501 = vector.load %arg4[%c10, %c0_153] : memref<16x128xf32, #tpu.memory_space<vmem>>, vector<1x1xf32>
    %502 = arith.truncf %499 : vector<64x16xf32> to vector<64x16xbf16>
    %cst_154 = arith.constant dense<0.000000e+00> : vector<64x1xf32>
    %503 = tpu.matmul %502, %500, %cst_154 {dimension_numbers = #tpu.dot_dimension_numbers<[1], [0], [0], [1], [0, 0, 1, 1], [], []>} : vector<64x16xbf16>, vector<16x1xbf16>, vector<64x1xf32> -> vector<64x1xf32>
    %504 = vector.broadcast %501 : vector<1x1xf32> to vector<64x1xf32>
    %505 = arith.addf %503, %504 : vector<64x1xf32>
    %c0_155 = arith.constant 0 : index
    %c0_156 = arith.constant 0 : index
    %506 = vector.load %arg5[%c0_155, %c0_156] : memref<64x1xf32, #tpu.memory_space<vmem>>, vector<64x1xf32>
    tpu.vector_store %arg5[%c0_155, %c0_156], %505 {strides = array<i32>} : memref<64x1xf32, #tpu.memory_space<vmem>>, vector<64x1xf32>,
    return
  }
  func.func @transform_0(%arg0: i32) -> (i32, i32) {
    %c0_i32 = arith.constant 0 : i32
    %c0_i32_0 = arith.constant 0 : i32
    return %arg0, %c0_i32 : i32, i32
  }
  func.func @transform_1(%arg0: i32) -> (i32, i32) {
    %c0_i32 = arith.constant 0 : i32
    %c0_i32_0 = arith.constant 0 : i32
    return %arg0, %c0_i32 : i32, i32
  }
  func.func @transform_2(%arg0: i32) -> (i32, i32) {
    %c0_i32 = arith.constant 0 : i32
    %c0_i32_0 = arith.constant 0 : i32
    %c0_i32_1 = arith.constant 0 : i32
    return %c0_i32, %c0_i32_0 : i32, i32
  }
  func.func @transform_3(%arg0: i32) -> (i32, i32) {
    %c0_i32 = arith.constant 0 : i32
    %c0_i32_0 = arith.constant 0 : i32
    %c0_i32_1 = arith.constant 0 : i32
    return %c0_i32, %c0_i32_0 : i32, i32
  }
  func.func @transform_4(%arg0: i32) -> (i32, i32) {
    %c0_i32 = arith.constant 0 : i32
    %c0_i32_0 = arith.constant 0 : i32
    return %arg0, %c0_i32 : i32, i32
  }
}

</mosaic_0001>

<bundles_post_ra>
// kernel: rnn_net_forward.1
= control target key start
LH: loop header
LB: loop body
LE: loop exit
PB: predicated region body
PF: predicated region fallthrough
CT: control target
= control target key end

     0   :  { %vm55_vm0 = vcmask 1045504   ;;  %vm56_vm1 = vcmask 1046528   ;;  %v2635_v1 = vmov 65535   ;;  %vm42_vm2 = vcmask 105472   ;;  %s2638_s26 = smov 64   ;;  %s2639_s29 = smov 32   ;;  %s3227_s2 = inlined_call_operand.vmem [shape: bf16[256,128], index: 2, kind: input, shape index: {}]   ;;  %s3228_s1 = inlined_call_operand.vmem [shape: f32[64,13], index: 1, kind: input, shape index: {}]   ;;  %s3229_s3 = inlined_call_operand.vmem [shape: f32[16,128], index: 3, kind: input, shape index: {}]   ;;  %s3230_s0 = inlined_call_operand.vmem [shape: s32[8,1], index: 0, kind: input, shape index: {}]   ;;  %s3231_s4 = inlined_call_operand.vmem [shape: f32[64,1], index: 4, kind: output, shape index: {}]  }
   0x1   :  { %v2523_v0 = vld [vmem:[%s3227_s2] sm:$0x7f]   ;;  %v57_v2 = vsel %vm55_vm0, 4294967295, %v2635_v1  ;;  %v19_v4 = vld [vmem:[%s3228_s1 + $0x8] sm:$0xff]  ;;  %v20_v5 = vld [vmem:[%s3228_s1 + $0x10] sm:$0xff]  ;;  %v2636_v19 = vmov 0.0  }
   0x2   :  { %v18_v3 = vld [vmem:[%s3228_s1] sm:$0xff]  ;;  %v58_v6 = vsel %vm56_vm1, %v57_v2, 0  ;;  %v21_v8 = vld [vmem:[%s3228_s1 + $0x18] sm:$0xff]  ;;  %v23_v10 = vld [vmem:[%s3228_s1 + $0x28] sm:$0xff]  ;;  %vm160_vm3 = vcmask 261120   ;;  %vm2637_vm4 = vmmov 0  }
   0x3   :  { %v29_v7 = vpack.c.bf16 %v19_v4, %v18_v3  ;;  %v22_v9 = vld [vmem:[%s3228_s1 + $0x20] sm:$0xff]  ;;  %v60_v11 = vand.u32 %v2523_v0, %v58_v6  ;;  %v24_v13 = vld [vmem:[%s3228_s1 + $0x30] sm:$0xff]  ;;  %v25_v14 = vld [vmem:[%s3228_s1 + $0x38] sm:$0xff]  ;;  %v30_v15 = vpack.c.bf16 %v21_v8, %v20_v5  ;;  %vm2027_vm0 = vcmask 130048  }
   0x4   :  { %v31_v12 = vpack.c.bf16 %v23_v10, %v22_v9  ;;  %v32_v16 = vpack.c.bf16 %v25_v14, %v24_v13  ;;  %v2524_v17 = vld [vmem:[%s3227_s2 + $0x8] sm:$0xff]   ;;  %v2525_v18 = vld [vmem:[%s3227_s2 + $0x10] sm:$0xff]   ;;  %v2118_v20 = vld [vmem:[%s3229_s3] ss:$0 sm:$0xff]  ;;  %vm2105_vm1 = vcmask 7168  }
   0x5   :  { %2287 = vmatprep.mubr.msk.bf16.mxu0 %vm42_vm2, %v29_v7  ;;  %2285 = vmatprep.subr.bf16.mxu0 %v60_v11  ;;  %v2710_v49 = vld [vmem:[%s3227_s2 + $0x28] sm:$0xff]   ;;  %v2527_v50 = vld [vmem:[%s3227_s2 + $0x18] sm:$0xff]   ;;  %v2528_v51 = vld [vmem:[%s3227_s2 + $0x20] sm:$0xff]  }
   0x6   :  { %2493 = vmatprep.subr.bf16.mxu1 %v60_v11  ;;  %2286 = vmatpush3.bf16.msra.mxu0 %v60_v11  ;;  %v2727_v52 = vld [vmem:[%s3227_s2 + $0x30] sm:$0xff]   ;;  %v2138_v53 = vld [vmem:[%s3229_s3 + $0x3] ss:$0 sm:$0xff]  ;;  %v2124_v55 = vld [vmem:[%s3229_s3 + $0x1] ss:$0 sm:$0xff] }
   0x7   :  { %2494 = vmatpush3.bf16.msra.mxu1 %v60_v11  ;;  %2291 = vmatprep.mubr.msk.bf16.mxu1 %vm42_vm2, %v31_v12  ;;  %v368_v54 = vpack.c.bf16 %v2138_v53, %v2138_v53 }
   0x8   :  { %2295 = vmatprep.subr.bf16.mxu1 %v2524_v17  ;;  %2307 = vmatprep.subr.bf16.mxu0 %v2527_v50 }
   0x9   :  { %2288 = vmatmul.mubr.msk.bf16.vlgmr.msra.gmra.mrb[0].mxu0 %vm42_vm2, %v30_v15 }
   0xa   :  { %2292 = vmatmul.mubr.msk.bf16.vlgmr.msra.gmra.mrb[0].mxu1 %vm42_vm2, %v32_v16  ;;  %2308 = vmatpush3.bf16.msra.mxu0 %v2527_v50 }
   0xb   :  { %2296 = vmatpush3.bf16.msra.mxu1 %v2524_v17  ;;  %2309 = vmatprep.subr.bf16.mxu0 %v2528_v51 }
   0xc   :  { %2297 = vmatprep.subr.bf16.mxu1 %v2525_v18 }
   0xe   :  { %2310 = vmatpush3.bf16.msra.mxu0 %v2528_v51 }
   0xf   :  { %2298 = vmatpush3.bf16.msra.mxu1 %v2525_v18  ;;  %2335 = vmatprep.subr.bf16.mxu0 %v2636_v19 }
  0x10   :  { %2319 = vmatprep.subr.bf16.mxu1 %v2636_v19 }
  0xdc   :  { %v2289_v21 = vpop.f32.mrb[0].mxu0 }
  0xdd   :  { %v2293_v22 = vpop.f32.mrb[0].mxu1  ;;  %v105_v23 = vadd.f32 %v2289_v21, %v2118_v20  ;;  %v96_v24 = vpop.f32.mrb[1].mxu0 }
  0xde   :  { %v121_v25 = vadd.f32 %v2293_v22, %v2118_v20  ;;  %v112_v26 = vpop.f32.mrb[1].mxu1  ;;  %v97_v27 = vadd.f32 %v2118_v20, %v96_v24  ;;  %v2290_v28 = vpop.f32.mrb[2].mxu0 }
  0xdf   :  { %v113_v29 = vadd.f32 %v2118_v20, %v112_v26  ;;  %v2294_v30 = vpop.f32.mrb[2].mxu1  ;;  %v108_v31 = vadd.f32 %v2290_v28, %v2118_v20  ;;  %v99_v32 = vpop.f32.mrb[3].mxu0  ;;  %v129_v39 = vmax.f32 %v105_v23, 0.0 }
  0xe0   :  { %v133_v33 = vmax.f32 %v121_v25, 0.0  ;;  %v124_v34 = vadd.f32 %v2294_v30, %v2118_v20  ;;  %v115_v35 = vpop.f32.mrb[3].mxu1  ;;  %v100_v36 = vadd.f32 %v2118_v20, %v99_v32  ;;  %v127_v42 = vmax.f32 %v97_v27, 0.0  ;;  %v2131_v25 = vld [vmem:[%s3229_s3 + $0x2] ss:$0 sm:$0xff] }
  0xe1   :  { %v131_v37 = vmax.f32 %v113_v29, 0.0  ;;  %v116_v38 = vadd.f32 %v2118_v20, %v115_v35  ;;  %v130_v40 = vmax.f32 %v108_v31, 0.0 }
  0xe2   :  { %v134_v41 = vmax.f32 %v124_v34, 0.0  ;;  %v128_v43 = vmax.f32 %v100_v36, 0.0  ;;  %v246_v36 = vlaneseq }
  0xe3   :  { %v132_v44 = vmax.f32 %v116_v38, 0.0  ;;  %v141_v45 = vpack.c.bf16 %v130_v40, %v129_v39 }
  0xe4   :  { %v143_v46 = vpack.c.bf16 %v134_v41, %v133_v33  ;;  %v140_v47 = vpack.c.bf16 %v128_v43, %v127_v42 }
  0xe5   :  { %v142_v48 = vpack.c.bf16 %v132_v44, %v131_v37  ;;  %v247_v37 = vand.u32 127, %v246_v36 }
  0xe6   :  { %2299 = vmatprep.mubr.msk.bf16.mxu1 %vm160_vm3, %v140_v47 }
  0xe7   :  { %2300 = vmatmul.mubr.msk.bf16.vlgmr.msra.gmra.mrb[4].mxu1 %vm160_vm3, %v141_v45  ;;  %vm248_vm5 = vcmp.ge.s32.totalorder %v247_v37, 64  ;;  %vm249_vm6 = vcmp.lt.s32.totalorder %v247_v37, 96 }
  0xe8   :  { %2303 = vmatprep.mubr.msk.bf16.mxu1 %vm160_vm3, %v142_v48  ;;  %2320 = vmatpush3.bf16.msra.mxu1 %v2710_v49  ;;  %vm2772_vm7 = vmand %vm248_vm5, %vm249_vm6 }
  0xe9   :  { %2321 = vmatprep.subr.bf16.mxu1 %v2636_v19 }
  0xec   :  { %2322 = vmatpush3.bf16.msra.mxu1 %v2727_v52 }
  0xed   :  { %2327 = vmatprep.subr.bf16.mxu1 %v2636_v19 }
  0xef   :  { %2304 = vmatmul.mubr.msk.bf16.gmra.mrb[8].mxu1 %vm160_vm3, %v143_v46 }
  0xf0   :  { %2323 = vmatprep.mubr.msk.bf16.mxu1 %vm2637_vm4, %v2636_v19 }
  0xf7   :  { %2324 = vmatmul.mubr.msk.bf16.vlgmr.msra.gmra.mrb[12].mxu1 %vm160_vm3, %v368_v54  ;;  %v2139_v54 = vld [vmem:[%s3229_s3 + $0x4] ss:$0 sm:$0xff] }
  0xf8   :  { %2328 = vmatpush3.bf16.msra.mxu1 %v2710_v49  ;;  %2331 = vmatprep.mubr.msk.bf16.mxu1 %vm2637_vm4, %v2636_v19 }
  0xf9   :  { %2329 = vmatprep.subr.bf16.mxu1 %v2636_v19 }
  0xfc   :  { %2330 = vmatpush3.bf16.msra.mxu1 %v2727_v52 }
  0xfd   :  { %2343 = vmatprep.subr.bf16.mxu1 %v2636_v19 }
 0x1ba   :  { %v2301_v56 = vpop.f32.mrb[4].mxu1 }
 0x1bb   :  { %v216_v57 = vadd.f32 %v2301_v56, %v2124_v55  ;;  %v207_v58 = vpop.f32.mrb[5].mxu1 }
 0x1bc   :  { %v208_v59 = vadd.f32 %v2124_v55, %v207_v58  ;;  %v2302_v60 = vpop.f32.mrb[6].mxu1 }
 0x1bd   :  { %v219_v61 = vadd.f32 %v2302_v60, %v2124_v55  ;;  %v210_v62 = vpop.f32.mrb[7].mxu1  ;;  %v240_v0 = vmax.f32 %v216_v57, 0.0 }
 0x1be   :  { %v211_v63 = vadd.f32 %v2124_v55, %v210_v62  ;;  %v238_v2 = vmax.f32 %v208_v59, 0.0 }
 0x1bf   :  { %v241_v1 = vmax.f32 %v219_v61, 0.0 }
 0x1c0   :  { %v239_v3 = vmax.f32 %v211_v63, 0.0 }
 0x1c1   :  { %v262_v4 = vpack.c.bf16 %v241_v1, %v240_v0 }
 0x1c2   :  { %v261_v5 = vpack.c.bf16 %v239_v3, %v238_v2  ;;  %v2305_v6 = vpop.f32.mrb[8].mxu1 }
 0x1c3   :  { %v232_v7 = vadd.f32 %v2305_v6, %v2124_v55  ;;  %v223_v8 = vpop.f32.mrb[9].mxu1 }
 0x1c4   :  { %2311 = vmatprep.mubr.msk.bf16.mxu0 %vm160_vm3, %v261_v5  ;;  %v224_v9 = vadd.f32 %v2124_v55, %v223_v8  ;;  %v2306_v10 = vpop.f32.mrb[10].mxu1 }
 0x1c5   :  { %2312 = vmatmul.mubr.msk.bf16.vlgmr.msra.gmra.mrb[4].mxu0 %vm160_vm3, %v262_v4  ;;  %v244_v11 = vmax.f32 %v232_v7, 0.0  ;;  %v235_v12 = vadd.f32 %v2306_v10, %v2124_v55  ;;  %v226_v13 = vpop.f32.mrb[11].mxu1 }
 0x1c6   :  { %v242_v14 = vmax.f32 %v224_v9, 0.0  ;;  %v227_v15 = vadd.f32 %v2124_v55, %v226_v13  ;;  %2336 = vmatpush3.bf16.msra.mxu0 %v2710_v49 }
 0x1c7   :  { %v245_v16 = vmax.f32 %v235_v12, 0.0  ;;  %2337 = vmatprep.subr.bf16.mxu0 %v2636_v19 }
 0x1c8   :  { %v243_v17 = vmax.f32 %v227_v15, 0.0 }
 0x1c9   :  { %v264_v18 = vpack.c.bf16 %v245_v16, %v244_v11 }
 0x1ca   :  { %v263_v20 = vpack.c.bf16 %v243_v17, %v242_v14  ;;  %2338 = vmatpush3.bf16.msra.mxu0 %v2727_v52  ;;  %v418_v21 = vpop.f32.mrb[12].mxu1 }
 0x1cb   :  { %2351 = vmatprep.subr.bf16.mxu0 %v2636_v19  ;;  %v2325_v22 = vpop.f32.mrb[13].mxu1 }
 0x1cc   :  { %2315 = vmatprep.mubr.msk.bf16.mxu0 %vm160_vm3, %v263_v20  ;;  %v421_v23 = vpop.f32.mrb[14].mxu1 }
 0x1cd   :  { %2316 = vmatmul.mubr.msk.bf16.gmra.mrb[8].mxu0 %vm160_vm3, %v264_v18  ;;  %v2326_v24 = vpop.f32.mrb[15].mxu1 }
 0x1ce   :  { %2339 = vmatprep.mubr.msk.bf16.mxu0 %vm2637_vm4, %v2636_v19 }
 0x298   :  { %v2313_v26 = vpop.f32.mrb[4].mxu0 }
 0x299   :  { %v2760_v27 = vadd.f32 %v2313_v26, %v2131_v25  ;;  %v327_v28 = vpop.f32.mrb[5].mxu0 }
 0x29a   :  { %v328_v29 = vadd.f32 %v2131_v25, %v327_v28  ;;  %v2314_v30 = vpop.f32.mrb[6].mxu0 }
 0x29b   :  { %v2762_v31 = vadd.f32 %v2314_v30, %v2131_v25  ;;  %v330_v32 = vpop.f32.mrb[7].mxu0 }
 0x29c   :  { %v424_v33 = vadd.f32 %v418_v21, %v328_v29  ;;  %v331_v34 = vadd.f32 %v2131_v25, %v330_v32 }
 0x29e   :  { %v425_v35 = vmul.f32 0.5, %v424_v33 }
 0x2a0   :  { %2539 = vtanh.f32 %v425_v35  ;;  %v2317_v38 = vpop.f32.mrb[8].mxu0 }
 0x2a1   :  { %2541 = vtanh.f32 %v424_v33  ;;  %v2764_v39 = vadd.f32 %v2317_v38, %v2131_v25  ;;  %v343_v40 = vpop.f32.mrb[9].mxu0 }
 0x2a2   :  { %v2766_v41 = vadd.f32 %v2131_v25, %v343_v40  ;;  %v2318_v42 = vpop.f32.mrb[10].mxu0 }
 0x2a3   :  { %v2768_v44 = vadd.f32 %v2318_v42, %v2131_v25  ;;  %v346_v45 = vpop.f32.mrb[11].mxu0 }
 0x2a4   :  { %v2770_v47 = vadd.f32 %v2131_v25, %v346_v45 }
 0x2aa   :  { %v2540_v43 = vpop.eup %2539 }
 0x2ab   :  { %v427_v46 = vmul.f32 0.5, %v2540_v43  ;;  %v2542_v51 = vpop.eup %2541 }
 0x2ad   :  { %v428_v50 = vadd.f32 0.5, %v427_v46 }
 0x2af   :  { %v430_v53 = vsel %vm2772_vm7, %v2542_v51, %v428_v50 }
 0x2b0   :  { %431 = vrot.lane.b32.xlu0 %v430_v53, %s2638_s26 }
 0x2b4   :  { %435 = vrot.lane.b32.xlu0 %v2139_v54, %s2639_s29 }
 0x322   :  { %v432_v55 = vpop.permute.xlu0 %431 }
 0x323   :  { %v433_v56 = vmul.f32 %v432_v55, %v430_v53 }
 0x325   :  { %440 = vrot.lane.b32.xlu1 %v433_v56, %s2639_s29 }
 0x326   :  { %v436_v57 = vpop.permute.xlu0 %435 }
 0x327   :  { %v438_v58 = vmul.f32 %v436_v57, %v430_v53 }
 0x397   :  { %v441_v59 = vpop.permute.xlu1 %440 }
 0x398   :  { %v443_v60 = vadd.f32 %v441_v59, %v438_v58 }
 0x39a   :  { %2543 = vtanh.f32 %v443_v60 }
 0x3a4   :  { %v2544_v61 = vpop.eup %2543 }
 0x3a5   :  { %446 = vrot.lane.b32.xlu1 %v2544_v61, %s2638_s26 }
 0x417   :  { %v447_v62 = vpop.permute.xlu1 %446 }
 0x418   :  { %v2785_v63 = vmul.f32 %v447_v62, %v430_v53 }
 0x41a   :  { %v455_v0 = vpack.c.bf16 %v2785_v63, %v2785_v63 }
 0x41c   :  { %457 = vrot.lane.b32.xlu0 %v455_v0, %s2639_s29 }
 0x48e   :  { %v458_v1 = vpop.permute.xlu0 %457 }
 0x48f   :  { %2332 = vmatmul.mubr.msk.bf16.vlgmr.msra.gmra.mrb[16].mxu1 %vm160_vm3, %v458_v1 }
 0x490   :  { %2344 = vmatpush3.bf16.msra.mxu1 %v2710_v49  ;;  %2347 = vmatprep.mubr.msk.bf16.mxu1 %vm2637_vm4, %v2636_v19 }
 0x491   :  { %2345 = vmatprep.subr.bf16.mxu1 %v2636_v19 }
 0x494   :  { %2346 = vmatpush3.bf16.msra.mxu1 %v2727_v52 }
 0x495   :  { %2359 = vmatprep.subr.bf16.mxu1 %v2636_v19 }
 0x562   :  { %v496_v2 = vpop.f32.mrb[16].mxu1 }
 0x563   :  { %v502_v3 = vadd.f32 %v496_v2, %v331_v34  ;;  %v2333_v4 = vpop.f32.mrb[17].mxu1 }
 0x564   :  { %v499_v5 = vpop.f32.mrb[18].mxu1 }
 0x565   :  { %v503_v6 = vmul.f32 0.5, %v502_v3  ;;  %v2334_v7 = vpop.f32.mrb[19].mxu1 }
 0x567   :  { %2545 = vtanh.f32 %v503_v6 }
 0x568   :  { %2547 = vtanh.f32 %v502_v3 }
 0x571   :  { %v2546_v8 = vpop.eup %2545 }
 0x572   :  { %v505_v9 = vmul.f32 0.5, %v2546_v8  ;;  %v2548_v11 = vpop.eup %2547 }
 0x574   :  { %v506_v10 = vadd.f32 0.5, %v505_v9 }
 0x576   :  { %v508_v12 = vsel %vm2772_vm7, %v2548_v11, %v506_v10 }
 0x577   :  { %509 = vrot.lane.b32.xlu1 %v508_v12, %s2638_s26  ;;  %v512_v15 = vmul.f32 %v508_v12, %v443_v60 }
 0x5e9   :  { %v510_v13 = vpop.permute.xlu1 %509 }
 0x5ea   :  { %v511_v14 = vmul.f32 %v510_v13, %v508_v12 }
 0x5ec   :  { %514 = vrot.lane.b32.xlu0 %v511_v14, %s2639_s29 }
 0x65e   :  { %v515_v16 = vpop.permute.xlu0 %514 }
 0x65f   :  { %v517_v17 = vadd.f32 %v515_v16, %v512_v15 }
 0x661   :  { %2549 = vtanh.f32 %v517_v17 }
 0x66b   :  { %v2550_v18 = vpop.eup %2549 }
 0x66c   :  { %520 = vrot.lane.b32.xlu1 %v2550_v18, %s2638_s26 }
 0x6de   :  { %v521_v20 = vpop.permute.xlu1 %520 }
 0x6df   :  { %v2802_v21 = vmul.f32 %v521_v20, %v508_v12 }
 0x6e1   :  { %v529_v22 = vpack.c.bf16 %v2802_v21, %v2802_v21 }
 0x6e3   :  { %531 = vrot.lane.b32.xlu0 %v529_v22, %s2639_s29 }
 0x755   :  { %v532_v23 = vpop.permute.xlu0 %531 }
 0x756   :  { %2340 = vmatmul.mubr.msk.bf16.vlgmr.msra.gmra.mrb[12].mxu0 %vm160_vm3, %v532_v23 }
 0x757   :  { %2352 = vmatpush3.bf16.msra.mxu0 %v2710_v49  ;;  %2355 = vmatprep.mubr.msk.bf16.mxu0 %vm2637_vm4, %v2636_v19 }
 0x758   :  { %2353 = vmatprep.subr.bf16.mxu0 %v2636_v19 }
 0x75b   :  { %2354 = vmatpush3.bf16.msra.mxu0 %v2727_v52 }
 0x75c   :  { %2367 = vmatprep.subr.bf16.mxu0 %v2636_v19 }
 0x829   :  { %v570_v24 = vpop.f32.mrb[12].mxu0 }
 0x82a   :  { %v576_v25 = vadd.f32 %v570_v24, %v2760_v27  ;;  %v2341_v26 = vpop.f32.mrb[13].mxu0 }
 0x82b   :  { %v573_v28 = vpop.f32.mrb[14].mxu0 }
 0x82c   :  { %v577_v29 = vmul.f32 0.5, %v576_v25  ;;  %v2342_v30 = vpop.f32.mrb[15].mxu0 }
 0x82e   :  { %2551 = vtanh.f32 %v577_v29 }
 0x82f   :  { %2553 = vtanh.f32 %v576_v25 }
 0x838   :  { %v2552_v32 = vpop.eup %2551 }
 0x839   :  { %v579_v33 = vmul.f32 0.5, %v2552_v32  ;;  %v2554_v35 = vpop.eup %2553 }
 0x83b   :  { %v580_v34 = vadd.f32 0.5, %v579_v33 }
 0x83d   :  { %v582_v36 = vsel %vm2772_vm7, %v2554_v35, %v580_v34 }
 0x83e   :  { %583 = vrot.lane.b32.xlu1 %v582_v36, %s2638_s26  ;;  %v586_v27 = vmul.f32 %v582_v36, %v517_v17 }
 0x8b0   :  { %v584_v37 = vpop.permute.xlu1 %583 }
 0x8b1   :  { %v585_v38 = vmul.f32 %v584_v37, %v582_v36 }
 0x8b3   :  { %588 = vrot.lane.b32.xlu0 %v585_v38, %s2639_s29 }
 0x925   :  { %v589_v40 = vpop.permute.xlu0 %588 }
 0x926   :  { %v591_v42 = vadd.f32 %v589_v40, %v586_v27 }
 0x928   :  { %2555 = vtanh.f32 %v591_v42 }
 0x932   :  { %v2556_v43 = vpop.eup %2555 }
 0x933   :  { %594 = vrot.lane.b32.xlu1 %v2556_v43, %s2638_s26 }
 0x9a5   :  { %v595_v45 = vpop.permute.xlu1 %594 }
 0x9a6   :  { %v2820_v46 = vmul.f32 %v595_v45, %v582_v36 }
 0x9a8   :  { %v603_v50 = vpack.c.bf16 %v2820_v46, %v2820_v46 }
 0x9aa   :  { %605 = vrot.lane.b32.xlu0 %v603_v50, %s2639_s29 }
 0xa1c   :  { %v606_v51 = vpop.permute.xlu0 %605 }
 0xa1d   :  { %2348 = vmatmul.mubr.msk.bf16.vlgmr.msra.gmra.mrb[20].mxu1 %vm160_vm3, %v606_v51 }
 0xa1e   :  { %2360 = vmatpush3.bf16.msra.mxu1 %v2710_v49  ;;  %2363 = vmatprep.mubr.msk.bf16.mxu1 %vm2637_vm4, %v2636_v19 }
 0xa1f   :  { %2361 = vmatprep.subr.bf16.mxu1 %v2636_v19 }
 0xa22   :  { %2362 = vmatpush3.bf16.msra.mxu1 %v2727_v52 }
 0xa23   :  { %2375 = vmatprep.subr.bf16.mxu1 %v2636_v19 }
 0xaf0   :  { %v644_v53 = vpop.f32.mrb[20].mxu1 }
 0xaf1   :  { %v650_v54 = vadd.f32 %v644_v53, %v2762_v31  ;;  %v2349_v55 = vpop.f32.mrb[21].mxu1 }
 0xaf2   :  { %v647_v56 = vpop.f32.mrb[22].mxu1 }
 0xaf3   :  { %v651_v57 = vmul.f32 0.5, %v650_v54  ;;  %v2350_v58 = vpop.f32.mrb[23].mxu1 }
 0xaf5   :  { %2557 = vtanh.f32 %v651_v57 }
 0xaf6   :  { %2559 = vtanh.f32 %v650_v54 }
 0xaff   :  { %v2558_v59 = vpop.eup %2557 }
 0xb00   :  { %v653_v60 = vmul.f32 0.5, %v2558_v59  ;;  %v2560_v62 = vpop.eup %2559 }
 0xb02   :  { %v654_v61 = vadd.f32 0.5, %v653_v60 }
 0xb04   :  { %v656_v0 = vsel %vm2772_vm7, %v2560_v62, %v654_v61 }
 0xb05   :  { %657 = vrot.lane.b32.xlu1 %v656_v0, %s2638_s26  ;;  %v660_v31 = vmul.f32 %v656_v0, %v591_v42 }
 0xb77   :  { %v658_v1 = vpop.permute.xlu1 %657 }
 0xb78   :  { %v659_v2 = vmul.f32 %v658_v1, %v656_v0 }
 0xb7a   :  { %662 = vrot.lane.b32.xlu0 %v659_v2, %s2639_s29 }
 0xbec   :  { %v663_v3 = vpop.permute.xlu0 %662 }
 0xbed   :  { %v665_v4 = vadd.f32 %v663_v3, %v660_v31 }
 0xbef   :  { %2561 = vtanh.f32 %v665_v4 }
 0xbf9   :  { %v2562_v5 = vpop.eup %2561 }
 0xbfa   :  { %668 = vrot.lane.b32.xlu1 %v2562_v5, %s2638_s26 }
 0xc6c   :  { %v669_v6 = vpop.permute.xlu1 %668 }
 0xc6d   :  { %v2838_v7 = vmul.f32 %v669_v6, %v656_v0 }
 0xc6f   :  { %v677_v8 = vpack.c.bf16 %v2838_v7, %v2838_v7 }
 0xc71   :  { %679 = vrot.lane.b32.xlu0 %v677_v8, %s2639_s29 }
 0xce3   :  { %v680_v9 = vpop.permute.xlu0 %679 }
 0xce4   :  { %2356 = vmatmul.mubr.msk.bf16.vlgmr.msra.gmra.mrb[16].mxu0 %vm160_vm3, %v680_v9 }
 0xce5   :  { %2368 = vmatpush3.bf16.msra.mxu0 %v2710_v49  ;;  %2371 = vmatprep.mubr.msk.bf16.mxu0 %vm2637_vm4, %v2636_v19 }
 0xce6   :  { %2369 = vmatprep.subr.bf16.mxu0 %v2636_v19 }
 0xce9   :  { %2370 = vmatpush3.bf16.msra.mxu0 %v2727_v52 }
 0xdb7   :  { %v718_v10 = vpop.f32.mrb[16].mxu0 }
 0xdb8   :  { %v724_v11 = vadd.f32 %v718_v10, %v2766_v41  ;;  %v2357_v12 = vpop.f32.mrb[17].mxu0 }
 0xdb9   :  { %v721_v13 = vpop.f32.mrb[18].mxu0 }
 0xdba   :  { %v725_v14 = vmul.f32 0.5, %v724_v11  ;;  %v2358_v15 = vpop.f32.mrb[19].mxu0  ;;  %v2530_v13 = vld [vmem:[%s3227_s2 + $0x38] sm:$0xff]  }
 0xdbb   :  { %2383 = vmatprep.subr.bf16.mxu0 %v2530_v13 }
 0xdbc   :  { %2563 = vtanh.f32 %v725_v14 }
 0xdbd   :  { %2565 = vtanh.f32 %v724_v11 }
 0xdc6   :  { %v2564_v16 = vpop.eup %2563 }
 0xdc7   :  { %v727_v17 = vmul.f32 0.5, %v2564_v16  ;;  %v2566_v20 = vpop.eup %2565 }
 0xdc9   :  { %v728_v18 = vadd.f32 0.5, %v727_v17 }
 0xdcb   :  { %v730_v22 = vsel %vm2772_vm7, %v2566_v20, %v728_v18 }
 0xdcc   :  { %731 = vrot.lane.b32.xlu1 %v730_v22, %s2638_s26  ;;  %v734_v41 = vmul.f32 %v730_v22, %v665_v4 }
 0xe3e   :  { %v732_v23 = vpop.permute.xlu1 %731 }
 0xe3f   :  { %v733_v24 = vmul.f32 %v732_v23, %v730_v22 }
 0xe41   :  { %736 = vrot.lane.b32.xlu0 %v733_v24, %s2639_s29 }
 0xeb3   :  { %v737_v25 = vpop.permute.xlu0 %736 }
 0xeb4   :  { %v739_v26 = vadd.f32 %v737_v25, %v734_v41  ;;  %v2916_v41 = vld [vmem:[%s3227_s2 + $0x48] sm:$0xff]   ;;  %v2924_v25 = vld [vmem:[%s3227_s2 + $0x50] sm:$0xff]  }
 0xeb6   :  { %2567 = vtanh.f32 %v739_v26 }
 0xec0   :  { %v2568_v28 = vpop.eup %2567 }
 0xec1   :  { %742 = vrot.lane.b32.xlu1 %v2568_v28, %s2638_s26 }
 0xf33   :  { %v743_v29 = vpop.permute.xlu1 %742 }
 0xf34   :  { %v2855_v30 = vmul.f32 %v743_v29, %v730_v22  ;;  %v2157_v29 = vld [vmem:[%s3229_s3 + $0x6] ss:$0 sm:$0xff] }
 0xf36   :  { %v751_v32 = vpack.c.bf16 %v2855_v30, %v2855_v30 }
 0xf38   :  { %753 = vrot.lane.b32.xlu0 %v751_v32, %s2639_s29  ;;  %v1097_v32 = vpack.c.bf16 %v2157_v29, %v2157_v29 }
 0xfaa   :  { %v754_v33 = vpop.permute.xlu0 %753 }
 0xfab   :  { %2364 = vmatmul.mubr.msk.bf16.vlgmr.msra.gmra.mrb[24].mxu1 %vm160_vm3, %v754_v33 }
 0xfac   :  { %2376 = vmatpush3.bf16.msra.mxu1 %v2710_v49  ;;  %2379 = vmatprep.mubr.msk.bf16.mxu1 %vm2637_vm4, %v2636_v19 }
 0xfad   :  { %2377 = vmatprep.subr.bf16.mxu1 %v2636_v19 }
 0xfb0   :  { %2378 = vmatpush3.bf16.msra.mxu1 %v2727_v52 }
 0xfb1   :  { %2395 = vmatprep.subr.bf16.mxu1 %v2636_v19 }
0x107e   :  { %v792_v34 = vpop.f32.mrb[24].mxu1 }
0x107f   :  { %v798_v35 = vadd.f32 %v792_v34, %v2770_v47  ;;  %v2365_v36 = vpop.f32.mrb[25].mxu1 }
0x1080   :  { %v795_v37 = vpop.f32.mrb[26].mxu1 }
0x1081   :  { %v799_v38 = vmul.f32 0.5, %v798_v35  ;;  %v2366_v27 = vpop.f32.mrb[27].mxu1 }
0x1083   :  { %2569 = vtanh.f32 %v799_v38 }
0x1084   :  { %2571 = vtanh.f32 %v798_v35 }
0x108d   :  { %v2570_v40 = vpop.eup %2569 }
0x108e   :  { %v801_v49 = vmul.f32 0.5, %v2570_v40  ;;  %v2572_v43 = vpop.eup %2571 }
0x1090   :  { %v802_v42 = vadd.f32 0.5, %v801_v49 }
0x1092   :  { %v804_v45 = vsel %vm2772_vm7, %v2572_v43, %v802_v42  ;;  %v2959_v42 = vld [vmem:[%s3229_s3 + $0x5] ss:$0 sm:$0xff] }
0x1093   :  { %805 = vrot.lane.b32.xlu1 %v804_v45, %s2638_s26  ;;  %v808_v47 = vmul.f32 %v804_v45, %v739_v26  ;;  %v2158_v26 = vld [vmem:[%s3229_s3 + $0x7] ss:$0 sm:$0xff] }
0x1105   :  { %v806_v52 = vpop.permute.xlu1 %805 }
0x1106   :  { %v807_v50 = vmul.f32 %v806_v52, %v804_v45 }
0x1108   :  { %810 = vrot.lane.b32.xlu0 %v807_v50, %s2639_s29 }
0x117a   :  { %v811_v51 = vpop.permute.xlu0 %810 }
0x117b   :  { %v813_v53 = vadd.f32 %v811_v51, %v808_v47 }
0x117d   :  { %2573 = vtanh.f32 %v813_v53 }
0x1187   :  { %v2574_v54 = vpop.eup %2573 }
0x1188   :  { %816 = vrot.lane.b32.xlu1 %v2574_v54, %s2638_s26 }
0x11fa   :  { %v817_v55 = vpop.permute.xlu1 %816 }
0x11fb   :  { %v2873_v56 = vmul.f32 %v817_v55, %v804_v45 }
0x11fd   :  { %v825_v57 = vpack.c.bf16 %v2873_v56, %v2873_v56 }
0x11ff   :  { %827 = vrot.lane.b32.xlu0 %v825_v57, %s2639_s29 }
0x1271   :  { %v828_v58 = vpop.permute.xlu0 %827 }
0x1272   :  { %2372 = vmatmul.mubr.msk.bf16.vlgmr.msra.gmra.mrb[20].mxu0 %vm160_vm3, %v828_v58 }
0x1273   :  { %2384 = vmatpush3.bf16.msra.mxu0 %v2530_v13 }
0x1345   :  { %v866_v59 = vpop.f32.mrb[20].mxu0 }
0x1346   :  { %v872_v60 = vadd.f32 %v866_v59, %v2764_v39  ;;  %v2373_v61 = vpop.f32.mrb[21].mxu0 }
0x1347   :  { %v869_v62 = vpop.f32.mrb[22].mxu0 }
0x1348   :  { %v873_v0 = vmul.f32 0.5, %v872_v60  ;;  %v2374_v1 = vpop.f32.mrb[23].mxu0 }
0x134a   :  { %2575 = vtanh.f32 %v873_v0 }
0x134b   :  { %2577 = vtanh.f32 %v872_v60 }
0x1354   :  { %v2576_v2 = vpop.eup %2575 }
0x1355   :  { %v875_v31 = vmul.f32 0.5, %v2576_v2  ;;  %v2578_v4 = vpop.eup %2577 }
0x1357   :  { %v876_v3 = vadd.f32 0.5, %v875_v31 }
0x1359   :  { %v878_v5 = vsel %vm2772_vm7, %v2578_v4, %v876_v3 }
0x135a   :  { %879 = vrot.lane.b32.xlu1 %v878_v5, %s2638_s26  ;;  %v882_v39 = vmul.f32 %v878_v5, %v813_v53 }
0x13cc   :  { %v880_v6 = vpop.permute.xlu1 %879 }
0x13cd   :  { %v881_v8 = vmul.f32 %v880_v6, %v878_v5 }
0x13cf   :  { %884 = vrot.lane.b32.xlu0 %v881_v8, %s2639_s29 }
0x13d3   :  { %451 = vrot.lane.b32.xlu0 %v2785_v63, %s2639_s29  ;;  %v2531_v63 = vld [vmem:[%s3227_s2 + $0x40] sm:$0xff]  }
0x13d4   :  { %2385 = vmatprep.subr.bf16.mxu0 %v2531_v63 }
0x13d5   :  { %2386 = vmatpush3.bf16.msra.mxu0 %v2531_v63 }
0x13d6   :  { %2411 = vmatprep.subr.bf16.mxu0 %v2636_v19 }
0x13d7   :  { %599 = vrot.lane.b32.xlu0 %v2820_v46, %s2639_s29 }
0x1441   :  { %v885_v9 = vpop.permute.xlu0 %884 }
0x1442   :  { %v2888_v10 = vadd.f32 %v885_v9, %v882_v39 }
0x1444   :  { %2579 = vtanh.f32 %v2888_v10 }
0x1445   :  { %v452_v11 = vpop.permute.xlu0 %451 }
0x1446   :  { %454 = vst.msk [vmem:[#allocation2] sm:$0xff] %vm160_vm3, %v452_v11 }
0x1449   :  { %v600_v12 = vpop.permute.xlu0 %599 }
0x144a   :  { %602 = vst.msk [vmem:[#allocation2 + $0x10] sm:$0xff] %vm160_vm3, %v600_v12 }
0x144d   :  { %v982_v20 = vld [vmem:[#allocation2] sm:$0xff] }
0x144e   :  { %v2580_v46 = vpop.eup %2579 }
0x144f   :  { %890 = vrot.lane.b32.xlu1 %v2580_v46, %s2638_s26 }
0x1453   :  { %525 = vrot.lane.b32.xlu1 %v2802_v21, %s2639_s29 }
0x1457   :  { %673 = vrot.lane.b32.xlu1 %v2838_v7, %s2639_s29  ;;  %v984_v7 = vld [vmem:[#allocation2 + $0x10] sm:$0xff] }
0x14c1   :  { %v891_v14 = vpop.permute.xlu1 %890 }
0x14c2   :  { %v2905_v15 = vmul.f32 %v891_v14, %v878_v5 }
0x14c4   :  { %v899_v16 = vpack.c.bf16 %v2905_v15, %v2905_v15 }
0x14c5   :  { %v526_v17 = vpop.permute.xlu1 %525 }
0x14c6   :  { %528 = vst.msk [vmem:[#allocation2 + $0x8] sm:$0xff] %vm160_vm3, %v526_v17  ;;  %901 = vrot.lane.b32.xlu0 %v899_v16, %s2639_s29 }
0x14c9   :  { %v674_v18 = vpop.permute.xlu1 %673 }
0x14ca   :  { %676 = vst.msk [vmem:[#allocation2 + $0x18] sm:$0xff] %vm160_vm3, %v674_v18  ;;  %1164 = vrot.lane.b32.xlu0 %v2158_v26, %s2639_s29 }
0x14cd   :  { %v983_v22 = vld [vmem:[#allocation2 + $0x8] sm:$0xff] }
0x14ce   :  { %v990_v21 = vpack.c.bf16 %v983_v22, %v982_v20 }
0x14d0   :  { %2387 = vmatprep.mubr.msk.bf16.mxu0 %vm160_vm3, %v990_v21 }
0x14d1   :  { %v985_v23 = vld [vmem:[#allocation2 + $0x18] sm:$0xff] }
0x14d2   :  { %v991_v24 = vpack.c.bf16 %v985_v23, %v984_v7 }
0x14d4   :  { %2388 = vmatmul.mubr.msk.bf16.vlgmr.msra.gmra.mrb[24].mxu0 %vm160_vm3, %v991_v24 }
0x14d5   :  { %2412 = vmatpush3.bf16.msra.mxu0 %v2916_v41 }
0x14d6   :  { %2413 = vmatprep.subr.bf16.mxu0 %v2636_v19 }
0x14d9   :  { %2414 = vmatpush3.bf16.msra.mxu0 %v2924_v25 }
0x14da   :  { %2427 = vmatprep.subr.bf16.mxu0 %v2636_v19 }
0x1538   :  { %v902_v28 = vpop.permute.xlu0 %901 }
0x1539   :  { %2380 = vmatmul.mubr.msk.bf16.vlgmr.msra.gmra.mrb[28].mxu1 %vm160_vm3, %v902_v28 }
0x153a   :  { %2396 = vmatpush3.bf16.msra.mxu1 %v2916_v41  ;;  %2399 = vmatprep.mubr.msk.bf16.mxu1 %vm2637_vm4, %v2636_v19 }
0x153b   :  { %2397 = vmatprep.subr.bf16.mxu1 %v2636_v19 }
0x153c   :  { %v1165_v62 = vpop.permute.xlu0 %1164 }
0x153e   :  { %2398 = vmatpush3.bf16.msra.mxu1 %v2924_v25 }
0x153f   :  { %2403 = vmatprep.subr.bf16.mxu1 %v2636_v19 }
0x1541   :  { %2400 = vmatmul.mubr.msk.bf16.vlgmr.msra.gmra.mrb[32].mxu1 %vm160_vm3, %v1097_v32 }
0x1542   :  { %2404 = vmatpush3.bf16.msra.mxu1 %v2916_v41  ;;  %2407 = vmatprep.mubr.msk.bf16.mxu1 %vm2637_vm4, %v2636_v19 }
0x1543   :  { %2405 = vmatprep.subr.bf16.mxu1 %v2636_v19 }
0x1546   :  { %2406 = vmatpush3.bf16.msra.mxu1 %v2924_v25 }
0x1547   :  { %2419 = vmatprep.subr.bf16.mxu1 %v2636_v19 }
0x15a7   :  { %v2949_v33 = vpop.f32.mrb[24].mxu0 }
0x15a8   :  { %v1056_v34 = vpop.f32.mrb[25].mxu0 }
0x15a9   :  { %v2951_v35 = vpop.f32.mrb[26].mxu0  ;;  %v1057_v43 = vadd.f32 %v2959_v42, %v1056_v34 }
0x15aa   :  { %v2953_v36 = vpop.f32.mrb[27].mxu0 }
0x15ab   :  { %v1060_v22 = vadd.f32 %v2959_v42, %v2953_v36 }
0x160c   :  { %v940_v37 = vpop.f32.mrb[28].mxu1 }
0x160d   :  { %v946_v38 = vadd.f32 %v940_v37, %v2768_v44  ;;  %v2381_v27 = vpop.f32.mrb[29].mxu1 }
0x160e   :  { %v943_v40 = vpop.f32.mrb[30].mxu1 }
0x160f   :  { %v2382_v49 = vpop.f32.mrb[31].mxu1  ;;  %v947_v61 = vmul.f32 0.5, %v946_v38 }
0x1614   :  { %v1147_v45 = vpop.f32.mrb[32].mxu1 }
0x1615   :  { %v1153_v52 = vadd.f32 %v1147_v45, %v1057_v43  ;;  %v2401_v50 = vpop.f32.mrb[33].mxu1 }
0x1616   :  { %v1150_v47 = vpop.f32.mrb[34].mxu1 }
0x1617   :  { %v1154_v51 = vmul.f32 0.5, %v1153_v52  ;;  %v2402_v53 = vpop.f32.mrb[35].mxu1 }
0x1619   :  { %2581 = vtanh.f32 %v1154_v51 }
0x161a   :  { %2583 = vtanh.f32 %v1153_v52 }
0x161b   :  { %2585 = vtanh.f32 %v947_v61 }
0x1623   :  { %v2582_v54 = vpop.eup %2581 }
0x1624   :  { %v1156_v44 = vmul.f32 0.5, %v2582_v54  ;;  %v2584_v57 = vpop.eup %2583 }
0x1625   :  { %v2586_v31 = vpop.eup %2585 }
0x1626   :  { %v1157_v55 = vadd.f32 0.5, %v1156_v44  ;;  %v949_v3 = vmul.f32 0.5, %v2586_v31 }
0x1628   :  { %v1159_v58 = vsel %vm2772_vm7, %v2584_v57, %v1157_v55  ;;  %v950_v5 = vadd.f32 0.5, %v949_v3 }
0x1629   :  { %1160 = vrot.lane.b32.xlu1 %v1159_v58, %s2638_s26  ;;  %v1167_v0 = vmul.f32 %v1165_v62, %v1159_v58 }
0x169b   :  { %v1161_v59 = vpop.permute.xlu1 %1160 }
0x169c   :  { %v1162_v60 = vmul.f32 %v1161_v59, %v1159_v58 }
0x169e   :  { %1169 = vrot.lane.b32.xlu1 %v1162_v60, %s2639_s29 }
0x1710   :  { %v1170_v1 = vpop.permute.xlu1 %1169 }
0x1711   :  { %v1172_v2 = vadd.f32 %v1170_v1, %v1167_v0  ;;  %v1065_v0 = vadd.f32 %v2949_v33, %v2959_v42 }
0x1713   :  { %2587 = vtanh.f32 %v1172_v2 }
0x1714   :  { %2589 = vtanh.f32 %v946_v38 }
0x171d   :  { %v2588_v4 = vpop.eup %2587 }
0x171e   :  { %1175 = vrot.lane.b32.xlu0 %v2588_v4, %s2638_s26  ;;  %v2590_v6 = vpop.eup %2589 }
0x171f   :  { %v952_v8 = vsel %vm2772_vm7, %v2590_v6, %v950_v5 }
0x1720   :  { %v956_v46 = vmul.f32 %v952_v8, %v2888_v10 }
0x1722   :  { %953 = vrot.lane.b32.xlu0 %v952_v8, %s2638_s26 }
0x1790   :  { %v1176_v39 = vpop.permute.xlu0 %1175 }
0x1791   :  { %v2970_v9 = vmul.f32 %v1176_v39, %v1159_v58 }
0x1793   :  { %v1194_v11 = vpack.c.bf16 %v2970_v9, %v2970_v9 }
0x1794   :  { %v954_v12 = vpop.permute.xlu0 %953 }
0x1795   :  { %v955_v13 = vmul.f32 %v954_v12, %v952_v8  ;;  %1196 = vrot.lane.b32.xlu1 %v1194_v11, %s2639_s29 }
0x1797   :  { %958 = vrot.lane.b32.xlu0 %v955_v13, %s2639_s29 }
0x1807   :  { %v1197_v63 = vpop.permute.xlu1 %1196 }
0x1808   :  { %2408 = vmatmul.mubr.msk.bf16.vlgmr.msra.gmra.mrb[36].mxu1 %vm160_vm3, %v1197_v63 }
0x1809   :  { %v959_v14 = vpop.permute.xlu0 %958  ;;  %2420 = vmatpush3.bf16.msra.mxu1 %v2916_v41  ;;  %2423 = vmatprep.mubr.msk.bf16.mxu1 %vm2637_vm4, %v2636_v19 }
0x180a   :  { %v961_v16 = vadd.f32 %v959_v14, %v956_v46  ;;  %2421 = vmatprep.subr.bf16.mxu1 %v2636_v19 }
0x180c   :  { %2591 = vtanh.f32 %v961_v16 }
0x180d   :  { %2422 = vmatpush3.bf16.msra.mxu1 %v2924_v25 }
0x180e   :  { %2435 = vmatprep.subr.bf16.mxu1 %v2636_v19 }
0x1816   :  { %v2592_v17 = vpop.eup %2591 }
0x1817   :  { %964 = vrot.lane.b32.xlu0 %v2592_v17, %s2638_s26 }
0x181b   :  { %747 = vrot.lane.b32.xlu0 %v2855_v30, %s2639_s29 }
0x181f   :  { %895 = vrot.lane.b32.xlu0 %v2905_v15, %s2639_s29 }
0x1889   :  { %v965_v10 = vpop.permute.xlu0 %964 }
0x188a   :  { %v967_v43 = vmul.f32 %v965_v10, %v952_v8 }
0x188d   :  { %v748_v18 = vpop.permute.xlu0 %747 }
0x188e   :  { %750 = vst.msk [vmem:[#allocation2 + $0x20] sm:$0xff] %vm160_vm3, %v748_v18 }
0x1891   :  { %v896_v20 = vpop.permute.xlu0 %895 }
0x1892   :  { %898 = vst.msk [vmem:[#allocation2 + $0x30] sm:$0xff] %vm160_vm3, %v896_v20 }
0x1895   :  { %v986_v53 = vld [vmem:[#allocation2 + $0x20] sm:$0xff] }
0x1899   :  { %v988_v44 = vld [vmem:[#allocation2 + $0x30] sm:$0xff] }
0x18db   :  { %v1235_v21 = vpop.f32.mrb[36].mxu1 }
0x18dc   :  { %v1241_v7 = vadd.f32 %v1235_v21, %v1060_v22  ;;  %v2409_v23 = vpop.f32.mrb[37].mxu1  ;;  %v1068_v22 = vadd.f32 %v2951_v35, %v2959_v42 }
0x18dd   :  { %v1238_v24 = vpop.f32.mrb[38].mxu1 }
0x18de   :  { %v1242_v26 = vmul.f32 0.5, %v1241_v7  ;;  %v2410_v28 = vpop.f32.mrb[39].mxu1 }
0x18e0   :  { %2593 = vtanh.f32 %v1242_v26 }
0x18e1   :  { %2595 = vtanh.f32 %v1241_v7 }
0x18ea   :  { %v2594_v30 = vpop.eup %2593 }
0x18eb   :  { %v1244_v15 = vmul.f32 0.5, %v2594_v30  ;;  %v2596_v32 = vpop.eup %2595 }
0x18ed   :  { %v1245_v29 = vadd.f32 0.5, %v1244_v15 }
0x18ef   :  { %v1247_v34 = vsel %vm2772_vm7, %v2596_v32, %v1245_v29 }
0x18f0   :  { %1248 = vrot.lane.b32.xlu1 %v1247_v34, %s2638_s26  ;;  %v1251_v36 = vmul.f32 %v1247_v34, %v1172_v2 }
0x1962   :  { %v1249_v37 = vpop.permute.xlu1 %1248 }
0x1963   :  { %v1250_v38 = vmul.f32 %v1249_v37, %v1247_v34 }
0x1965   :  { %1253 = vrot.lane.b32.xlu1 %v1250_v38, %s2639_s29 }
0x19d7   :  { %v1254_v27 = vpop.permute.xlu1 %1253 }
0x19d8   :  { %v1256_v40 = vadd.f32 %v1254_v27, %v1251_v36 }
0x19da   :  { %2597 = vtanh.f32 %v1256_v40 }
0x19e4   :  { %v2598_v49 = vpop.eup %2597 }
0x19e5   :  { %1259 = vrot.lane.b32.xlu1 %v2598_v49, %s2638_s26 }
0x19e9   :  { %821 = vrot.lane.b32.xlu1 %v2873_v56, %s2639_s29 }
0x19ed   :  { %969 = vrot.lane.b32.xlu1 %v967_v43, %s2639_s29 }
0x1a57   :  { %v1260_v45 = vpop.permute.xlu1 %1259 }
0x1a58   :  { %v3001_v52 = vmul.f32 %v1260_v45, %v1247_v34 }
0x1a5a   :  { %v1278_v50 = vpack.c.bf16 %v3001_v52, %v3001_v52 }
0x1a5b   :  { %v822_v47 = vpop.permute.xlu1 %821 }
0x1a5c   :  { %824 = vst.msk [vmem:[#allocation2 + $0x28] sm:$0xff] %vm160_vm3, %v822_v47  ;;  %1280 = vrot.lane.b32.xlu0 %v1278_v50, %s2639_s29 }
0x1a5f   :  { %v970_v51 = vpop.permute.xlu1 %969 }
0x1a60   :  { %972 = vst.msk [vmem:[#allocation2 + $0x38] sm:$0xff] %vm160_vm3, %v970_v51 }
0x1a63   :  { %v987_v54 = vld [vmem:[#allocation2 + $0x28] sm:$0xff] }
0x1a64   :  { %v992_v56 = vpack.c.bf16 %v987_v54, %v986_v53 }
0x1a66   :  { %2391 = vmatprep.mubr.msk.bf16.mxu0 %vm160_vm3, %v992_v56 }
0x1a67   :  { %v989_v55 = vld [vmem:[#allocation2 + $0x38] sm:$0xff] }
0x1a68   :  { %v993_v57 = vpack.c.bf16 %v989_v55, %v988_v44 }
0x1a6a   :  { %2392 = vmatmul.mubr.msk.bf16.gmra.mrb[28].mxu0 %vm160_vm3, %v993_v57 }
0x1a6b   :  { %2415 = vmatprep.mubr.msk.bf16.mxu0 %vm2637_vm4, %v2636_v19 }
0x1ace   :  { %v1281_v58 = vpop.permute.xlu0 %1280 }
0x1acf   :  { %2416 = vmatmul.mubr.msk.bf16.vlgmr.msra.gmra.mrb[32].mxu0 %vm160_vm3, %v1281_v58 }
0x1ad0   :  { %2428 = vmatpush3.bf16.msra.mxu0 %v2916_v41  ;;  %2431 = vmatprep.mubr.msk.bf16.mxu0 %vm2637_vm4, %v2636_v19 }
0x1ad1   :  { %2429 = vmatprep.subr.bf16.mxu0 %v2636_v19 }
0x1ad4   :  { %2430 = vmatpush3.bf16.msra.mxu0 %v2924_v25 }
0x1ad5   :  { %2443 = vmatprep.subr.bf16.mxu0 %v2636_v19 }
0x1b3d   :  { %v3019_v59 = vpop.f32.mrb[28].mxu0 }
0x1b3e   :  { %v3021_v60 = vpop.f32.mrb[29].mxu0 }
0x1b3f   :  { %v3023_v61 = vpop.f32.mrb[30].mxu0  ;;  %v1073_v47 = vadd.f32 %v2959_v42, %v3021_v60 }
0x1b40   :  { %v3025_v62 = vpop.f32.mrb[31].mxu0 }
0x1ba2   :  { %v1319_v1 = vpop.f32.mrb[32].mxu0 }
0x1ba3   :  { %v1325_v2 = vadd.f32 %v1319_v1, %v1065_v0  ;;  %v2417_v31 = vpop.f32.mrb[33].mxu0 }
0x1ba4   :  { %v1322_v3 = vpop.f32.mrb[34].mxu0 }
0x1ba5   :  { %v1326_v4 = vmul.f32 0.5, %v1325_v2  ;;  %v2418_v5 = vpop.f32.mrb[35].mxu0 }
0x1ba7   :  { %2599 = vtanh.f32 %v1326_v4 }
0x1ba8   :  { %2601 = vtanh.f32 %v1325_v2 }
0x1bb1   :  { %v2600_v6 = vpop.eup %2599 }
0x1bb2   :  { %v1328_v8 = vmul.f32 0.5, %v2600_v6  ;;  %v2602_v11 = vpop.eup %2601 }
0x1bb4   :  { %v1329_v39 = vadd.f32 0.5, %v1328_v8 }
0x1bb6   :  { %v1331_v12 = vsel %vm2772_vm7, %v2602_v11, %v1329_v39 }
0x1bb7   :  { %1332 = vrot.lane.b32.xlu1 %v1331_v12, %s2638_s26  ;;  %v1335_v33 = vmul.f32 %v1331_v12, %v1256_v40 }
0x1c29   :  { %v1333_v13 = vpop.permute.xlu1 %1332 }
0x1c2a   :  { %v1334_v63 = vmul.f32 %v1333_v13, %v1331_v12  ;;  %v1076_v13 = vadd.f32 %v2959_v42, %v3025_v62 }
0x1c2c   :  { %1337 = vrot.lane.b32.xlu0 %v1334_v63, %s2639_s29 }
0x1c9e   :  { %v1338_v46 = vpop.permute.xlu0 %1337 }
0x1c9f   :  { %v1340_v14 = vadd.f32 %v1338_v46, %v1335_v33 }
0x1ca1   :  { %2603 = vtanh.f32 %v1340_v14 }
0x1cab   :  { %v2604_v16 = vpop.eup %2603 }
0x1cac   :  { %1343 = vrot.lane.b32.xlu1 %v2604_v16, %s2638_s26 }
0x1d1e   :  { %v1344_v17 = vpop.permute.xlu1 %1343 }
0x1d1f   :  { %v3034_v10 = vmul.f32 %v1344_v17, %v1331_v12 }
0x1d21   :  { %v1362_v18 = vpack.c.bf16 %v3034_v10, %v3034_v10 }
0x1d23   :  { %1364 = vrot.lane.b32.xlu0 %v1362_v18, %s2639_s29 }
0x1d95   :  { %v1365_v20 = vpop.permute.xlu0 %1364 }
0x1d96   :  { %2424 = vmatmul.mubr.msk.bf16.vlgmr.msra.gmra.mrb[40].mxu1 %vm160_vm3, %v1365_v20 }
0x1d97   :  { %2436 = vmatpush3.bf16.msra.mxu1 %v2916_v41  ;;  %2439 = vmatprep.mubr.msk.bf16.mxu1 %vm2637_vm4, %v2636_v19 }
0x1d98   :  { %2437 = vmatprep.subr.bf16.mxu1 %v2636_v19 }
0x1d9b   :  { %2438 = vmatpush3.bf16.msra.mxu1 %v2924_v25 }
0x1d9c   :  { %2451 = vmatprep.subr.bf16.mxu1 %v2636_v19 }
0x1e69   :  { %v1403_v21 = vpop.f32.mrb[40].mxu1 }
0x1e6a   :  { %v1409_v7 = vadd.f32 %v1403_v21, %v1068_v22  ;;  %v2425_v23 = vpop.f32.mrb[41].mxu1 }
0x1e6b   :  { %v1406_v24 = vpop.f32.mrb[42].mxu1 }
0x1e6c   :  { %v1410_v26 = vmul.f32 0.5, %v1409_v7  ;;  %v2426_v28 = vpop.f32.mrb[43].mxu1 }
0x1e6e   :  { %2605 = vtanh.f32 %v1410_v26 }
0x1e6f   :  { %2607 = vtanh.f32 %v1409_v7 }
0x1e78   :  { %v2606_v30 = vpop.eup %2605 }
0x1e79   :  { %v1412_v15 = vmul.f32 0.5, %v2606_v30  ;;  %v2608_v32 = vpop.eup %2607 }
0x1e7b   :  { %v1413_v29 = vadd.f32 0.5, %v1412_v15 }
0x1e7d   :  { %v1415_v34 = vsel %vm2772_vm7, %v2608_v32, %v1413_v29  ;;  %v1081_v32 = vadd.f32 %v3019_v59, %v2959_v42 }
0x1e7e   :  { %1416 = vrot.lane.b32.xlu1 %v1415_v34, %s2638_s26  ;;  %v1419_v35 = vmul.f32 %v1415_v34, %v1340_v14 }
0x1ef0   :  { %v1417_v37 = vpop.permute.xlu1 %1416 }
0x1ef1   :  { %v1418_v38 = vmul.f32 %v1417_v37, %v1415_v34 }
0x1ef3   :  { %1421 = vrot.lane.b32.xlu0 %v1418_v38, %s2639_s29 }
0x1f65   :  { %v1422_v36 = vpop.permute.xlu0 %1421 }
0x1f66   :  { %v1424_v27 = vadd.f32 %v1422_v36, %v1419_v35 }
0x1f68   :  { %2609 = vtanh.f32 %v1424_v27 }
0x1f72   :  { %v2610_v40 = vpop.eup %2609 }
0x1f73   :  { %1427 = vrot.lane.b32.xlu1 %v2610_v40, %s2638_s26 }
0x1fe5   :  { %v1428_v49 = vpop.permute.xlu1 %1427 }
0x1fe6   :  { %v3053_v43 = vmul.f32 %v1428_v49, %v1415_v34 }
0x1fe8   :  { %v1446_v45 = vpack.c.bf16 %v3053_v43, %v3053_v43 }
0x1fea   :  { %1448 = vrot.lane.b32.xlu0 %v1446_v45, %s2639_s29 }
0x205c   :  { %v1449_v50 = vpop.permute.xlu0 %1448 }
0x205d   :  { %2432 = vmatmul.mubr.msk.bf16.vlgmr.msra.gmra.mrb[36].mxu0 %vm160_vm3, %v1449_v50 }
0x205e   :  { %2444 = vmatpush3.bf16.msra.mxu0 %v2916_v41  ;;  %2447 = vmatprep.mubr.msk.bf16.mxu0 %vm2637_vm4, %v2636_v19 }
0x205f   :  { %2445 = vmatprep.subr.bf16.mxu0 %v2636_v19 }
0x2062   :  { %2446 = vmatpush3.bf16.msra.mxu0 %v2924_v25 }
0x2130   :  { %v1487_v51 = vpop.f32.mrb[36].mxu0 }
0x2131   :  { %v1493_v53 = vadd.f32 %v1487_v51, %v1073_v47  ;;  %v2433_v54 = vpop.f32.mrb[37].mxu0 }
0x2132   :  { %v1490_v56 = vpop.f32.mrb[38].mxu0 }
0x2133   :  { %v1494_v44 = vmul.f32 0.5, %v1493_v53  ;;  %v2434_v55 = vpop.f32.mrb[39].mxu0 }
0x2135   :  { %2611 = vtanh.f32 %v1494_v44 }
0x2136   :  { %2613 = vtanh.f32 %v1493_v53 }
0x213f   :  { %v2612_v57 = vpop.eup %2611 }
0x2140   :  { %v1496_v58 = vmul.f32 0.5, %v2612_v57  ;;  %v2614_v1 = vpop.eup %2613 }
0x2142   :  { %v1497_v0 = vadd.f32 0.5, %v1496_v58 }
0x2144   :  { %v1499_v2 = vsel %vm2772_vm7, %v2614_v1, %v1497_v0  ;;  %v2640_v1 = vmov 0  }
0x2145   :  { %1500 = vrot.lane.b32.xlu1 %v1499_v2, %s2638_s26  ;;  %v1503_v60 = vmul.f32 %v1499_v2, %v1424_v27  ;;  %2507 = vset.pattern.permute.xlu0 %v2640_v1 }
0x2146   :  { %2501 = vset.pattern.permute.xlu1 %v2640_v1 }
0x21b7   :  { %v1501_v31 = vpop.permute.xlu1 %1500 }
0x21b8   :  { %v1502_v3 = vmul.f32 %v1501_v31, %v1499_v2 }
0x21ba   :  { %1505 = vrot.lane.b32.xlu0 %v1502_v3, %s2639_s29 }
0x222c   :  { %v1506_v4 = vpop.permute.xlu0 %1505 }
0x222d   :  { %v1508_v5 = vadd.f32 %v1506_v4, %v1503_v60 }
0x222f   :  { %2615 = vtanh.f32 %v1508_v5 }
0x2239   :  { %v2616_v6 = vpop.eup %2615 }
0x223a   :  { %1511 = vrot.lane.b32.xlu1 %v2616_v6, %s2638_s26 }
0x22ac   :  { %v1512_v8 = vpop.permute.xlu1 %1511 }
0x22ad   :  { %v3071_v39 = vmul.f32 %v1512_v8, %v1499_v2  ;;  %v1084_v2 = vadd.f32 %v3023_v61, %v2959_v42  ;;  %v251_v8 = vld [vmem:[%s3230_s0] sm:$0xff] }
0x22ae   :  { %vm1179_vm8 = vcmp.gt.s32.totalorder %v251_v8, 0  ;;  %vm1263_vm9 = vcmp.gt.s32.totalorder %v251_v8, 1  ;;  %vm1515_vm10 = vcmp.gt.s32.totalorder %v251_v8, 4  ;;  %vm1599_vm11 = vcmp.gt.s32.totalorder %v251_v8, 5 }
0x22af   :  { %v1530_v11 = vpack.c.bf16 %v3071_v39, %v3071_v39  ;;  %v2164_v42 = vsel %vm1263_vm9, 1.0, %v2636_v19  ;;  %vm1683_vm12 = vcmp.gt.s32.totalorder %v251_v8, 6  ;;  %vm1767_vm13 = vcmp.gt.s32.totalorder %v251_v8, 7 }
0x22b0   :  { %vm1347_vm14 = vcmp.gt.s32.totalorder %v251_v8, 2  ;;  %vm1431_vm15 = vcmp.gt.s32.totalorder %v251_v8, 3 }
0x22b1   :  { %1532 = vrot.lane.b32.xlu0 %v1530_v11, %s2639_s29 }
0x2323   :  { %v1533_v12 = vpop.permute.xlu0 %1532 }
0x2324   :  { %2440 = vmatmul.mubr.msk.bf16.vlgmr.msra.gmra.mrb[44].mxu1 %vm160_vm3, %v1533_v12 }
0x2325   :  { %2452 = vmatpush3.bf16.msra.mxu1 %v2916_v41  ;;  %2455 = vmatprep.mubr.msk.bf16.mxu1 %vm2637_vm4, %v2636_v19 }
0x2326   :  { %2453 = vmatprep.subr.bf16.mxu1 %v2636_v19 }
0x2329   :  { %2454 = vmatpush3.bf16.msra.mxu1 %v2924_v25 }
0x23f7   :  { %v1571_v63 = vpop.f32.mrb[44].mxu1 }
0x23f8   :  { %v1577_v33 = vadd.f32 %v1571_v63, %v1076_v13  ;;  %v2441_v46 = vpop.f32.mrb[45].mxu1  ;;  %v2162_v63 = vsel %vm1179_vm8, 1.0, %v2636_v19 }
0x23f9   :  { %v1574_v14 = vpop.f32.mrb[46].mxu1  ;;  %v2502_v46 = vpack.i.bf16 %v2164_v42, %v2162_v63 }
0x23fa   :  { %v1578_v16 = vmul.f32 0.5, %v1577_v33  ;;  %v2442_v17 = vpop.f32.mrb[47].mxu1  ;;  %v2170_v14 = vsel %vm1515_vm10, 1.0, %v2636_v19 }
0x23fc   :  { %2617 = vtanh.f32 %v1578_v16  ;;  %v2172_v16 = vsel %vm1599_vm11, 1.0, %v2636_v19 }
0x23fd   :  { %2619 = vtanh.f32 %v1577_v33  ;;  %v2513_v17 = vpack.i.bf16 %v2172_v16, %v2170_v14  ;;  %v2537_v14 = vld [vmem:[%s3227_s2 + $0x70] sm:$0xff]  }
0x2406   :  { %v2618_v18 = vpop.eup %2617 }
0x2407   :  { %v1580_v41 = vmul.f32 0.5, %v2618_v18  ;;  %v2620_v22 = vpop.eup %2619  ;;  %v2174_v18 = vsel %vm1683_vm12, 1.0, %v2636_v19 }
0x2409   :  { %v1581_v20 = vadd.f32 0.5, %v1580_v41  ;;  %v2176_v41 = vsel %vm1767_vm13, 1.0, %v2636_v19 }
0x240a   :  { %v2518_v48 = vpack.i.bf16 %v2176_v41, %v2174_v18 }
0x240b   :  { %v1583_v21 = vsel %vm2772_vm7, %v2620_v22, %v1581_v20  ;;  %v2166_v22 = vsel %vm1347_vm14, 1.0, %v2636_v19 }
0x240c   :  { %1584 = vrot.lane.b32.xlu1 %v1583_v21, %s2638_s26  ;;  %v1587_v62 = vmul.f32 %v1583_v21, %v1508_v5 }
0x247e   :  { %v1585_v25 = vpop.permute.xlu1 %1584 }
0x247f   :  { %v1586_v7 = vmul.f32 %v1585_v25, %v1583_v21 }
0x2481   :  { %1589 = vrot.lane.b32.xlu0 %v1586_v7, %s2639_s29 }
0x24f3   :  { %v1590_v23 = vpop.permute.xlu0 %1589 }
0x24f4   :  { %v1592_v24 = vadd.f32 %v1590_v23, %v1587_v62  ;;  %v1182_v23 = vmax.f32 %v2970_v9, 0.0 }
0x24f6   :  { %2621 = vtanh.f32 %v1592_v24 }
0x2500   :  { %v2622_v26 = vpop.eup %2621 }
0x2501   :  { %1595 = vrot.lane.b32.xlu1 %v2622_v26, %s2638_s26 }
0x2573   :  { %v1596_v28 = vpop.permute.xlu1 %1595 }
0x2574   :  { %v3089_v30 = vmul.f32 %v1596_v28, %v1583_v21  ;;  %v2168_v21 = vsel %vm1431_vm15, 1.0, %v2636_v19 }
0x2575   :  { %v2508_v7 = vpack.i.bf16 %v2168_v21, %v2166_v22 }
0x2576   :  { %v1614_v15 = vpack.c.bf16 %v3089_v30, %v3089_v30 }
0x2578   :  { %1616 = vrot.lane.b32.xlu0 %v1614_v15, %s2639_s29 }
0x25ea   :  { %v1617_v29 = vpop.permute.xlu0 %1616 }
0x25eb   :  { %2448 = vmatmul.mubr.msk.bf16.vlgmr.msra.gmra.mrb[40].mxu0 %vm160_vm3, %v1617_v29 }
0x26be   :  { %v1655_v34 = vpop.f32.mrb[40].mxu0 }
0x26bf   :  { %v1661_v37 = vadd.f32 %v1655_v34, %v1081_v32  ;;  %v2449_v38 = vpop.f32.mrb[41].mxu0 }
0x26c0   :  { %v1658_v35 = vpop.f32.mrb[42].mxu0  ;;  %v2534_v38 = vld [vmem:[%s3227_s2 + $0x58] sm:$0xff]  }
0x26c1   :  { %v1662_v36 = vmul.f32 0.5, %v1661_v37  ;;  %v2450_v27 = vpop.f32.mrb[43].mxu0  ;;  %2459 = vmatprep.subr.bf16.mxu0 %v2534_v38 }
0x26c2   :  { %2460 = vmatpush3.bf16.msra.mxu0 %v2534_v38  ;;  %v1350_v27 = vmax.f32 %v3034_v10, 0.0 }
0x26c3   :  { %2623 = vtanh.f32 %v1662_v36 }
0x26c4   :  { %2625 = vtanh.f32 %v1661_v37 }
0x26cd   :  { %v2624_v40 = vpop.eup %2623 }
0x26ce   :  { %v1664_v49 = vmul.f32 0.5, %v2624_v40  ;;  %v2626_v50 = vpop.eup %2625  ;;  %v1434_v40 = vmax.f32 %v3053_v43, 0.0 }
0x26d0   :  { %v1665_v45 = vadd.f32 0.5, %v1664_v49 }
0x26d2   :  { %v1667_v47 = vsel %vm2772_vm7, %v2626_v50, %v1665_v45 }
0x26d3   :  { %1668 = vrot.lane.b32.xlu1 %v1667_v47, %s2638_s26  ;;  %v1671_v59 = vmul.f32 %v1667_v47, %v1592_v24  ;;  %v1266_v24 = vmax.f32 %v3001_v52, 0.0  ;;  %v2535_v52 = vld [vmem:[%s3227_s2 + $0x60] sm:$0xff]  }
0x26d4   :  { %2461 = vmatprep.subr.bf16.mxu0 %v2535_v52 }
0x26d5   :  { %2462 = vmatpush3.bf16.msra.mxu0 %v2535_v52 }
0x2745   :  { %v1669_v51 = vpop.permute.xlu1 %1668 }
0x2746   :  { %v1670_v53 = vmul.f32 %v1669_v51, %v1667_v47 }
0x2748   :  { %1673 = vrot.lane.b32.xlu0 %v1670_v53, %s2639_s29 }
0x27ba   :  { %v1674_v54 = vpop.permute.xlu0 %1673 }
0x27bb   :  { %v3101_v56 = vadd.f32 %v1674_v54, %v1671_v59  ;;  %v1518_v54 = vmax.f32 %v3071_v39, 0.0 }
0x27bd   :  { %2627 = vtanh.f32 %v3101_v56 }
0x27c7   :  { %v2628_v44 = vpop.eup %2627 }
0x27c8   :  { %1679 = vrot.lane.b32.xlu1 %v2628_v44, %s2638_s26 }
0x283a   :  { %v1680_v55 = vpop.permute.xlu1 %1679 }
0x283b   :  { %v3105_v57 = vmul.f32 %v1680_v55, %v1667_v47 }
0x283d   :  { %v1698_v58 = vpack.c.bf16 %v3105_v57, %v3105_v57  ;;  %v1686_v55 = vmax.f32 %v3105_v57, 0.0 }
0x283f   :  { %1700 = vrot.lane.b32.xlu0 %v1698_v58, %s2639_s29 }
0x28b1   :  { %v1701_v0 = vpop.permute.xlu0 %1700 }
0x28b2   :  { %2456 = vmatmul.mubr.msk.bf16.vlgmr.msra.gmra.mrb[48].mxu1 %vm160_vm3, %v1701_v0 }
0x2985   :  { %v1739_v31 = vpop.f32.mrb[48].mxu1 }
0x2986   :  { %v1745_v3 = vadd.f32 %v1739_v31, %v1084_v2  ;;  %v2457_v60 = vpop.f32.mrb[49].mxu1 }
0x2987   :  { %v1742_v4 = vpop.f32.mrb[50].mxu1 }
0x2988   :  { %v1746_v5 = vmul.f32 0.5, %v1745_v3  ;;  %v2458_v6 = vpop.f32.mrb[51].mxu1 }
0x298a   :  { %2629 = vtanh.f32 %v1746_v5 }
0x298b   :  { %2631 = vtanh.f32 %v1745_v3 }
0x2994   :  { %v2630_v11 = vpop.eup %2629 }
0x2995   :  { %v1748_v12 = vmul.f32 0.5, %v2630_v11  ;;  %v2632_v61 = vpop.eup %2631 }
0x2997   :  { %v1749_v13 = vadd.f32 0.5, %v1748_v12 }
0x2999   :  { %v3120_v33 = vsel %vm2772_vm7, %v2632_v61, %v1749_v13 }
0x299a   :  { %1752 = vrot.lane.b32.xlu1 %v3120_v33, %s2638_s26  ;;  %v1755_v19 = vmul.f32 %v3120_v33, %v3101_v56  ;;  %v1602_v56 = vmax.f32 %v3089_v30, 0.0 }
0x299e   :  { %2503 = vperm.xlu1 %2501, %v2502_v46   ;;  %v2536_v46 = vld [vmem:[%s3227_s2 + $0x68] sm:$0xff]  }
0x299f   :  { %2471 = vmatprep.subr.bf16.mxu1 %v2536_v46 }
0x29a0   :  { %2472 = vmatpush3.bf16.msra.mxu1 %v2536_v46 }
0x29a1   :  { %2473 = vmatprep.subr.bf16.mxu1 %v2537_v14 }
0x29a2   :  { %2514 = vperm.xlu1 %2501, %v2513_v17  }
0x29a4   :  { %2474 = vmatpush3.bf16.msra.mxu1 %v2537_v14  ;;  %v2191_v14 = vld [vmem:[%s3229_s3 + $0xa] ss:$0 sm:$0xff] }
0x29a6   :  { %2519 = vperm.xlu1 %2501, %v2518_v48   ;;  %v2177_v48 = vld [vmem:[%s3229_s3 + $0x8] ss:$0 sm:$0xff] }
0x2a0c   :  { %v1753_v20 = vpop.permute.xlu1 %1752 }
0x2a0d   :  { %v1754_v25 = vmul.f32 %v1753_v20, %v3120_v33 }
0x2a0f   :  { %1757 = vrot.lane.b32.xlu0 %v1754_v25, %s2639_s29 }
0x2a13   :  { %2509 = vperm.xlu0 %2507, %v2508_v7  }
0x2a1d   :  { %v2504_v62 = vpop.permute.xlu1 %2503 }
0x2a1e   :  { %v2506_v26 = vunpack.i.h.bf16 %v2504_v62  ;;  %v2505_v28 = vunpack.i.l.bf16 %v2504_v62 }
0x2a20   :  { %v1272_v15 = vmul.f32 %v2506_v26, %v1266_v24  ;;  %v1188_v29 = vmul.f32 %v2505_v28, %v1182_v23 }
0x2a21   :  { %v2515_v37 = vpop.permute.xlu1 %2514 }
0x2a22   :  { %1190 = vrot.lane.b32.xlu1 %v1188_v29, %s2639_s29  ;;  %v2517_v47 = vunpack.i.h.bf16 %v2515_v37  ;;  %v2516_v51 = vunpack.i.l.bf16 %v2515_v37 }
0x2a24   :  { %v1608_v10 = vmul.f32 %v2517_v47, %v1602_v56  ;;  %v1524_v43 = vmul.f32 %v2516_v51, %v1518_v54 }
0x2a25   :  { %v2520_v35 = vpop.permute.xlu1 %2519 }
0x2a26   :  { %v2521_v44 = vunpack.i.l.bf16 %v2520_v35  ;;  %v2522_v30 = vunpack.i.h.bf16 %v2520_v35 }
0x2a28   :  { %v1692_v58 = vmul.f32 %v2521_v44, %v1686_v55 }
0x2a81   :  { %v1758_v32 = vpop.permute.xlu0 %1757 }
0x2a82   :  { %v1760_v34 = vadd.f32 %v1758_v32, %v1755_v19 }
0x2a84   :  { %2633 = vtanh.f32 %v1760_v34  ;;  %v2538_v34 = vld [vmem:[%s3227_s2 + $0x78] sm:$0xff]  }
0x2a85   :  { %2483 = vmatprep.subr.bf16.mxu0 %v2538_v34 }
0x2a8e   :  { %v2634_v9 = vpop.eup %2633 }
0x2a8f   :  { %1763 = vrot.lane.b32.xlu0 %v2634_v9, %s2638_s26 }
0x2a92   :  { %v2510_v36 = vpop.permute.xlu0 %2509 }
0x2a93   :  { %v2512_v49 = vunpack.i.h.bf16 %v2510_v36  ;;  %v2511_v45 = vunpack.i.l.bf16 %v2510_v36  ;;  %1274 = vrot.lane.b32.xlu0 %v1272_v15, %s2639_s29 }
0x2a94   :  { %v1191_v50 = vpop.permute.xlu1 %1190 }
0x2a95   :  { %v1440_v53 = vmul.f32 %v2512_v49, %v1434_v40  ;;  %v1356_v59 = vmul.f32 %v2511_v45, %v1350_v27  ;;  %1193 = vst.msk [vmem:[#allocation2] sm:$0xff] %vm160_vm3, %v1191_v50 }
0x2a97   :  { %1442 = vrot.lane.b32.xlu0 %v1440_v53, %s2639_s29  ;;  %1358 = vrot.lane.b32.xlu1 %v1356_v59, %s2639_s29  ;;  %v2184_v59 = vld [vmem:[%s3229_s3 + $0x9] ss:$0 sm:$0xff] }
0x2a9b   :  { %1610 = vrot.lane.b32.xlu0 %v1608_v10, %s2639_s29  ;;  %1526 = vrot.lane.b32.xlu1 %v1524_v43, %s2639_s29 }
0x2a9c   :  { %v1782_v5 = vld [vmem:[#allocation2] sm:$0xff] }
0x2a9f   :  { %1694 = vrot.lane.b32.xlu1 %v1692_v58, %s2639_s29 }
0x2b01   :  { %v1764_v0 = vpop.permute.xlu0 %1763 }
0x2b02   :  { %v1766_v39 = vmul.f32 %v1764_v0, %v3120_v33 }
0x2b04   :  { %v1770_v1 = vmax.f32 %v1766_v39, 0.0 }
0x2b05   :  { %v1275_v2 = vpop.permute.xlu0 %1274 }
0x2b06   :  { %v1776_v31 = vmul.f32 %v2522_v30, %v1770_v1  ;;  %1277 = vst.msk [vmem:[#allocation2 + $0x8] sm:$0xff] %vm160_vm3, %v1275_v2 }
0x2b08   :  { %1778 = vrot.lane.b32.xlu0 %v1776_v31, %s2639_s29 }
0x2b09   :  { %v1443_v3 = vpop.permute.xlu0 %1442  ;;  %v1359_v57 = vpop.permute.xlu1 %1358 }
0x2b0a   :  { %1445 = vst.msk [vmem:[#allocation2 + $0x18] sm:$0xff] %vm160_vm3, %v1443_v3  ;;  %1361 = vst.msk [vmem:[#allocation2 + $0x10] sm:$0xff] %vm160_vm3, %v1359_v57 }
0x2b0d   :  { %v1611_v60 = vpop.permute.xlu0 %1610  ;;  %v1527_v4 = vpop.permute.xlu1 %1526  ;;  %v1783_v6 = vld [vmem:[#allocation2 + $0x8] sm:$0xff] }
0x2b0e   :  { %1613 = vst.msk [vmem:[#allocation2 + $0x28] sm:$0xff] %vm160_vm3, %v1611_v60  ;;  %1529 = vst.msk [vmem:[#allocation2 + $0x20] sm:$0xff] %vm160_vm3, %v1527_v4  ;;  %v1795_v8 = vpack.c.bf16 %v1783_v6, %v1782_v5 }
0x2b10   :  { %2463 = vmatprep.mubr.msk.bf16.mxu0 %vm160_vm3, %v1795_v8 }
0x2b11   :  { %v1695_v11 = vpop.permute.xlu1 %1694  ;;  %v1784_v12 = vld [vmem:[#allocation2 + $0x10] sm:$0xff]  ;;  %v1785_v13 = vld [vmem:[#allocation2 + $0x18] sm:$0xff] }
0x2b12   :  { %1697 = vst.msk [vmem:[#allocation2 + $0x30] sm:$0xff] %vm160_vm3, %v1695_v11  ;;  %v1796_v63 = vpack.c.bf16 %v1785_v13, %v1784_v12 }
0x2b14   :  { %2464 = vmatmul.mubr.msk.bf16.vlgmr.msra.gmra.mrb[44].mxu0 %vm160_vm3, %v1796_v63 }
0x2b15   :  { %v1786_v42 = vld [vmem:[#allocation2 + $0x20] sm:$0xff]  ;;  %v1787_v61 = vld [vmem:[#allocation2 + $0x28] sm:$0xff]  ;;  %2484 = vmatpush3.bf16.msra.mxu0 %v2538_v34 }
0x2b16   :  { %v1797_v33 = vpack.c.bf16 %v1787_v61, %v1786_v42 }
0x2b18   :  { %2467 = vmatprep.mubr.msk.bf16.mxu0 %vm160_vm3, %v1797_v33 }
0x2b19   :  { %v1788_v17 = vld [vmem:[#allocation2 + $0x30] sm:$0xff] }
0x2b7a   :  { %v1779_v16 = vpop.permute.xlu0 %1778 }
0x2b7b   :  { %1781 = vst.msk [vmem:[#allocation2 + $0x38] sm:$0xff] %vm160_vm3, %v1779_v16 }
0x2b82   :  { %v1789_v18 = vld [vmem:[#allocation2 + $0x38] sm:$0xff] }
0x2b83   :  { %v1798_v41 = vpack.c.bf16 %v1789_v18, %v1788_v17 }
0x2b85   :  { %2468 = vmatmul.mubr.msk.bf16.gmra.mrb[48].mxu0 %vm160_vm3, %v1798_v41 }
0x2be7   :  { %v2465_v20 = vpop.f32.mrb[44].mxu0 }
0x2be8   :  { %v1870_v22 = vadd.f32 %v2465_v20, %v2177_v48  ;;  %v1861_v21 = vpop.f32.mrb[45].mxu0 }
0x2be9   :  { %v1862_v25 = vadd.f32 %v2177_v48, %v1861_v21  ;;  %v2466_v7 = vpop.f32.mrb[46].mxu0 }
0x2bea   :  { %v1873_v62 = vadd.f32 %v2466_v7, %v2177_v48  ;;  %v1864_v23 = vpop.f32.mrb[47].mxu0  ;;  %v1894_v26 = vmax.f32 %v1870_v22, 0.0 }
0x2beb   :  { %v1865_v24 = vadd.f32 %v2177_v48, %v1864_v23  ;;  %v1892_v15 = vmax.f32 %v1862_v25, 0.0 }
0x2bec   :  { %v1895_v28 = vmax.f32 %v1873_v62, 0.0 }
0x2bed   :  { %v1893_v29 = vmax.f32 %v1865_v24, 0.0 }
0x2bee   :  { %v1906_v19 = vpack.c.bf16 %v1895_v28, %v1894_v26 }
0x2bef   :  { %v1905_v32 = vpack.c.bf16 %v1893_v29, %v1892_v15 }
0x2bf1   :  { %2475 = vmatprep.mubr.msk.bf16.mxu1 %vm160_vm3, %v1905_v32 }
0x2bf2   :  { %2476 = vmatmul.mubr.msk.bf16.vlgmr.msra.gmra.mrb[52].mxu1 %vm160_vm3, %v1906_v19 }
0x2c58   :  { %v2469_v37 = vpop.f32.mrb[48].mxu0 }
0x2c59   :  { %v1886_v38 = vadd.f32 %v2469_v37, %v2177_v48  ;;  %v1877_v9 = vpop.f32.mrb[49].mxu0 }
0x2c5a   :  { %v1878_v52 = vadd.f32 %v2177_v48, %v1877_v9  ;;  %v2470_v35 = vpop.f32.mrb[50].mxu0 }
0x2c5b   :  { %v1889_v36 = vadd.f32 %v2470_v35, %v2177_v48  ;;  %v1880_v27 = vpop.f32.mrb[51].mxu0  ;;  %v1898_v49 = vmax.f32 %v1886_v38, 0.0 }
0x2c5c   :  { %v1881_v40 = vadd.f32 %v2177_v48, %v1880_v27  ;;  %v1896_v50 = vmax.f32 %v1878_v52, 0.0 }
0x2c5d   :  { %v1899_v45 = vmax.f32 %v1889_v36, 0.0 }
0x2c5e   :  { %v1897_v47 = vmax.f32 %v1881_v40, 0.0 }
0x2c5f   :  { %v1908_v51 = vpack.c.bf16 %v1899_v45, %v1898_v49 }
0x2c60   :  { %v1907_v53 = vpack.c.bf16 %v1897_v47, %v1896_v50 }
0x2c62   :  { %2479 = vmatprep.mubr.msk.bf16.mxu1 %vm160_vm3, %v1907_v53 }
0x2c63   :  { %2480 = vmatmul.mubr.msk.bf16.gmra.mrb[56].mxu1 %vm160_vm3, %v1908_v51 }
0x2cc5   :  { %v2477_v54 = vpop.f32.mrb[52].mxu1 }
0x2cc6   :  { %v1980_v56 = vadd.f32 %v2477_v54, %v2184_v59  ;;  %v1971_v10 = vpop.f32.mrb[53].mxu1 }
0x2cc7   :  { %v1972_v43 = vadd.f32 %v2184_v59, %v1971_v10  ;;  %v2478_v44 = vpop.f32.mrb[54].mxu1 }
0x2cc8   :  { %v1983_v55 = vadd.f32 %v2478_v44, %v2184_v59  ;;  %v1974_v58 = vpop.f32.mrb[55].mxu1  ;;  %v2004_v39 = vmax.f32 %v1980_v56, 0.0 }
0x2cc9   :  { %v1975_v0 = vadd.f32 %v2184_v59, %v1974_v58  ;;  %v2002_v1 = vmax.f32 %v1972_v43, 0.0 }
0x2cca   :  { %v2005_v30 = vmax.f32 %v1983_v55, 0.0 }
0x2ccb   :  { %v2003_v2 = vmax.f32 %v1975_v0, 0.0 }
0x2ccc   :  { %v2014_v31 = vpack.c.bf16 %v2005_v30, %v2004_v39 }
0x2ccd   :  { %v2013_v3 = vpack.c.bf16 %v2003_v2, %v2002_v1 }
0x2ccf   :  { %2485 = vmatprep.mubr.msk.bf16.mxu0 %vm2027_vm0, %v2013_v3 }
0x2cd0   :  { %2486 = vmatmul.mubr.msk.bf16.vlgmr.msra.gmra.mrb[52].mxu0 %vm2027_vm0, %v2014_v31 }
0x2d36   :  { %v2481_v57 = vpop.f32.mrb[56].mxu1 }
0x2d37   :  { %v1996_v60 = vadd.f32 %v2481_v57, %v2184_v59  ;;  %v1987_v4 = vpop.f32.mrb[57].mxu1 }
0x2d38   :  { %v1988_v5 = vadd.f32 %v2184_v59, %v1987_v4  ;;  %v2482_v6 = vpop.f32.mrb[58].mxu1 }
0x2d39   :  { %v1999_v8 = vadd.f32 %v2482_v6, %v2184_v59  ;;  %v1990_v11 = vpop.f32.mrb[59].mxu1  ;;  %v2008_v13 = vmax.f32 %v1996_v60, 0.0 }
0x2d3a   :  { %v1991_v12 = vadd.f32 %v2184_v59, %v1990_v11  ;;  %v2006_v42 = vmax.f32 %v1988_v5, 0.0 }
0x2d3b   :  { %v2009_v63 = vmax.f32 %v1999_v8, 0.0 }
0x2d3c   :  { %v2007_v61 = vmax.f32 %v1991_v12, 0.0 }
0x2d3d   :  { %v2016_v33 = vpack.c.bf16 %v2009_v63, %v2008_v13 }
0x2d3e   :  { %v2015_v46 = vpack.c.bf16 %v2007_v61, %v2006_v42 }
0x2d40   :  { %2489 = vmatprep.mubr.msk.bf16.mxu0 %vm2027_vm0, %v2015_v46 }
0x2d41   :  { %2490 = vmatmul.mubr.msk.bf16.gmra.mrb[56].mxu0 %vm2027_vm0, %v2016_v33 }
0x2da3   :  { %v2487_v16 = vpop.f32.mrb[52].mxu0 }
0x2da4   :  { %v2083_v17 = vadd.f32 %v2487_v16, %v2191_v14  ;;  %v2074_v18 = vpop.f32.mrb[53].mxu0 }
0x2da5   :  { %v2075_v41 = vadd.f32 %v2191_v14, %v2074_v18  ;;  %v2488_v48 = vpop.f32.mrb[54].mxu0 }
0x2da6   :  { %2108 = vst.msk [vmem:[%s3231_s4 + $0x10] sm:$0xff] %vm2105_vm1, %v2083_v17  ;;  %v2086_v20 = vadd.f32 %v2488_v48, %v2191_v14  ;;  %v2077_v22 = vpop.f32.mrb[55].mxu0 }
0x2da7   :  { %2106 = vst.msk [vmem:[%s3231_s4] sm:$0xff] %vm2105_vm1, %v2075_v41  ;;  %v2078_v21 = vadd.f32 %v2191_v14, %v2077_v22 }
0x2da8   :  { %2109 = vst.msk [vmem:[%s3231_s4 + $0x18] sm:$0xff] %vm2105_vm1, %v2086_v20 }
0x2da9   :  { %2107 = vst.msk [vmem:[%s3231_s4 + $0x8] sm:$0xff] %vm2105_vm1, %v2078_v21 }
0x2e14   :  { %v2491_v25 = vpop.f32.mrb[56].mxu0 }
0x2e15   :  { %v2099_v7 = vadd.f32 %v2491_v25, %v2191_v14  ;;  %v2090_v62 = vpop.f32.mrb[57].mxu0 }
0x2e16   :  { %v2091_v23 = vadd.f32 %v2191_v14, %v2090_v62  ;;  %v2492_v24 = vpop.f32.mrb[58].mxu0 }
0x2e17   :  { %2112 = vst.msk [vmem:[%s3231_s4 + $0x30] sm:$0xff] %vm2105_vm1, %v2099_v7  ;;  %v2102_v26 = vadd.f32 %v2492_v24, %v2191_v14  ;;  %v2093_v28 = vpop.f32.mrb[59].mxu0 }
0x2e18   :  { %2110 = vst.msk [vmem:[%s3231_s4 + $0x20] sm:$0xff] %vm2105_vm1, %v2091_v23  ;;  %v2094_v15 = vadd.f32 %v2191_v14, %v2093_v28 }
0x2e19   :  { %2113 = vst.msk [vmem:[%s3231_s4 + $0x38] sm:$0xff] %vm2105_vm1, %v2102_v26 }
0x2e1a   :  { %2111 = vst.msk [vmem:[%s3231_s4 + $0x28] sm:$0xff] %vm2105_vm1, %v2094_v15 }

</bundles_post_ra>
